<compile_context>
chip_gen: v7x
topology: tpu7x:2x2x1
jax: 0.10.0
libtpu: 0.0.40
codegen_flags: <defaults>
</compile_context>

<pallas_src>
import jax
import jax.numpy as jnp
from jax.experimental import pallas as pl
from jax.experimental.pallas import tpu as pltpu

# ---- small test config (full model: M=1000, NN=32, J=32, CFG=[64]*5, FC1=512) ----
B = 2
M = 8              # nodes_num_list[i] == last_layer
NN = 4             # nn_num_list[i]
J = 4              # J_num[i]
EMBED_DIM = 8      # data.embed_dim
ENCODE_DIM = 5     # self.encode_dim (fixed by the module)
IN_FEAT = 16       # data.w
CFG = [32] * 5     # cfgs
FC1_DIM = 64       # 512 in full model
NUM_CLASSES = 20
E = M * NN         # edge_num
NUM_LAYERS = len(CFG)


# ---------------- edge encoding (shared across layers, computed once) ----------------

def edge_encode_kernel(maps_ref, w_ref, b_ref, e_ref, esq_ref):
    # Node-major, lane-dense: (M, NN*EMB) @ kron(I_NN, edge_fc_w) + b_tiled -> (M, NN*ENC)
    e = (jnp.dot(maps_ref[...], w_ref[...], preferred_element_type=jnp.float32)
         + b_ref[...])
    e_ref[...] = e
    esq_ref[...] = e * e          # e^2 hoisted here (layer-invariant)


def edge_encode(maps, w, b):
    maps2 = maps.reshape(M, NN * EMBED_DIM)                       # node-major edges
    wblk = jnp.kron(jnp.eye(NN, dtype=jnp.float32), w)            # (NN*EMB, NN*ENC)
    bblk = jnp.tile(b, (1, NN))                                   # (1, NN*ENC)
    return pl.pallas_call(
        edge_encode_kernel,
        out_shape=(jax.ShapeDtypeStruct((M, NN * ENCODE_DIM), jnp.float32),
                   jax.ShapeDtypeStruct((M, NN * ENCODE_DIM), jnp.float32)),
    )(maps2, wblk, bblk)


# ---------------- Gaussian-mixture edge weights + per-node softmax (all layers) -------

def attn_kernel(e2_ref, esq_ref, a_ref, b_ref, c_ref, s_ref, o_ref):
    # Quadratic expansion q = (e*e)@sigma^T - 2 e@(sigma*mu)^T + sum(sigma*mu^2), kept
    # 2-D via block-diagonal (kron) operands.  NOTE: expansion can lose precision via
    # cancellation if |e| >> |e - mu|; fine at these scales (checked vs reference).
    q = (jnp.dot(esq_ref[...], a_ref[0], preferred_element_type=jnp.float32)
         - 2.0 * jnp.dot(e2_ref[...], b_ref[0], preferred_element_type=jnp.float32)
         + c_ref[0])                                              # (M, NN*J)
    p = jnp.exp(-0.5 * q)                                         # mixture components
    w = jnp.dot(p, s_ref[...], preferred_element_type=jnp.float32)  # (M, NN)
    w = w - jnp.max(w, axis=-1, keepdims=True)
    ew = jnp.exp(w)
    o_ref[0] = ew / jnp.sum(ew, axis=-1, keepdims=True)


def attention_all_layers(e2, e2sq, A_all, B_all, c_all, S):
    nl = A_all.shape[0]
    ke = NN * ENCODE_DIM
    kj = NN * J
    return pl.pallas_call(
        attn_kernel,
        out_shape=jax.ShapeDtypeStruct((nl, M, NN), jnp.float32),
        grid=(nl,),
        in_specs=[
            pl.BlockSpec((M, ke), lambda l: (0, 0)),
            pl.BlockSpec((M, ke), lambda l: (0, 0)),
            pl.BlockSpec((1, ke, kj), lambda l: (l, 0, 0)),
            pl.BlockSpec((1, ke, kj), lambda l: (l, 0, 0)),
            pl.BlockSpec((1, 1, kj), lambda l: (l, 0, 0)),
            pl.BlockSpec((kj, NN), lambda l: (0, 0)),
        ],
        out_specs=pl.BlockSpec((1, M, NN), lambda l: (l, 0, 0)),
        compiler_params=pltpu.CompilerParams(dimension_semantics=("parallel",)),
    )(e2, e2sq, A_all, B_all, c_all, S)


# ---------------- GCN layer: (folded BN+ReLU) -> L@x, x@w -> partial BN stats ---------

def _make_gcn_kernel(apply_act):
    def gcn_layer_kernel(L_ref, x_ref, scale_ref, shift_ref, w1_ref, w2_ref, bias_ref,
                         y_ref, psum_ref, psq_ref):
        xin = x_ref[...]                                          # (M, Fin)
        if apply_act:
            # previous layer's BatchNorm + ReLU folded in as a per-feature affine + ReLU
            x = jnp.maximum(xin * scale_ref[...] + shift_ref[...], 0.0)
        else:
            x = xin                                               # raw model input (layer 0)
        lx = jnp.dot(L_ref[...], x, preferred_element_type=jnp.float32)        # (M, Fin)
        y = (jnp.dot(lx, w1_ref[...], preferred_element_type=jnp.float32)
             + jnp.dot(x, w2_ref[...], preferred_element_type=jnp.float32)
             + bias_ref[...])                                     # (M, Fout)
        y_ref[...] = y                                            # written once, lane-dense
        # per-batch-element partial BN statistics (reduced over batch in the wrapper)
        psum_ref[...] = jnp.sum(y, axis=0, keepdims=True)
        psq_ref[...] = jnp.sum(y * y, axis=0, keepdims=True)
    return gcn_layer_kernel


def gcn_layer(L, x_pre, scale, shift, w1, w2, bias, *, apply_act):
    bsz, m, fin = x_pre.shape
    fout = w1.shape[1]
    need = 4 * (2 * m * m + 2 * m * fin + 2 * m * fout
                + 2 * fin * fout + 2 * fin + fout + 4 * fout)
    vmem_limit = int(min(max(2 * need, 16 * 1024 * 1024), 48 * 1024 * 1024))
    return pl.pallas_call(
        _make_gcn_kernel(apply_act),
        out_shape=(jax.ShapeDtypeStruct((bsz, m, fout), jnp.float32),
                   jax.ShapeDtypeStruct((bsz, 1, fout), jnp.float32),
                   jax.ShapeDtypeStruct((bsz, 1, fout), jnp.float32)),
        grid=(bsz,),
        in_specs=[
            pl.BlockSpec((m, m), lambda b: (0, 0)),               # L stays resident
            pl.BlockSpec((None, m, fin), lambda b: (b, 0, 0)),
            pl.BlockSpec((1, fin), lambda b: (0, 0)),
            pl.BlockSpec((1, fin), lambda b: (0, 0)),
            pl.BlockSpec((fin, fout), lambda b: (0, 0)),
            pl.BlockSpec((fin, fout), lambda b: (0, 0)),
            pl.BlockSpec((1, fout), lambda b: (0, 0)),
        ],
        out_specs=(
            pl.BlockSpec((None, m, fout), lambda b: (b, 0, 0)),
            pl.BlockSpec((None, 1, fout), lambda b: (b, 0, 0)),
            pl.BlockSpec((None, 1, fout), lambda b: (b, 0, 0)),
        ),
        compiler_params=pltpu.CompilerParams(
            dimension_semantics=("parallel",),                    # batch axis -> megacore on v7x
            vmem_limit_bytes=vmem_limit),
    )(L, x_pre, scale, shift, w1, w2, bias)


# ---------------- MLP head: (folded last BN+ReLU) -> bf16-streamed fc1 -> ReLU -> fc2 --

def mlp_head_kernel(x_ref, scale_ref, shift_ref, w1_ref, b1_ref, w2_ref, b2_ref,
                    o_ref, acc_ref):
    k = pl.program_id(0)

    @pl.when(k == 0)
    def _():
        acc_ref[...] = jnp.zeros_like(acc_ref)

    # last GCN layer's BatchNorm + ReLU applied per K-tile (f32), then bf16 MXU dot
    h = jnp.maximum(x_ref[...] * scale_ref[...] + shift_ref[...], 0.0)
    acc_ref[...] += jnp.dot(h.astype(jnp.bfloat16), w1_ref[...],
                            preferred_element_type=jnp.float32)

    @pl.when(k == pl.num_programs(0) - 1)
    def _():
        hh = jnp.maximum(acc_ref[...] + b1_ref[...], 0.0)         # dropout = identity (eval)
        o_ref[...] = jnp.dot(hh, w2_ref[...],
                             preferred_element_type=jnp.float32) + b2_ref[...]


def _pick_tk(K, fc1, budget_bytes=12 * 1024 * 1024):
    # Any 128-multiple divisor of K whose double-buffered bf16 w1 tile fits the budget.
    divs = [t for t in range(128, K + 1, 128) if K % t == 0]
    good = [t for t in divs if K // t >= 2 and 2 * t * fc1 * 2 <= budget_bytes]
    if good:
        return max(good)
    if divs:
        return min(divs)
    # TODO(synk): add a cdiv + masked-remainder path for K with no 128-multiple divisor.
    return K


def mlp_head(x, scale, shift, w1_bf16, b1, w2, b2, tk=None):
    bsz, K = x.shape
    fc1 = w1_bf16.shape[1]
    ncls = w2.shape[1]
    if tk is None:
        tk = _pick_tk(K, fc1)
    need = (2 * tk * fc1 * 2            # double-buffered bf16 w1 tiles
            + 2 * bsz * tk * 4          # x tiles (f32; BN+ReLU applied in-kernel)
            + 4 * tk * 4                # scale / shift tiles
            + bsz * fc1 * 4             # f32 accumulator
            + (fc1 * ncls + fc1 + ncls + 2 * bsz * ncls) * 4)
    vmem_limit = int(min(max(2 * need, 16 * 1024 * 1024), 48 * 1024 * 1024))
    return pl.pallas_call(
        mlp_head_kernel,
        out_shape=jax.ShapeDtypeStruct((bsz, ncls), jnp.float32),
        grid=(K // tk,),
        in_specs=[
            pl.BlockSpec((bsz, tk), lambda k: (0, k)),
            pl.BlockSpec((1, tk), lambda k: (0, k)),
            pl.BlockSpec((1, tk), lambda k: (0, k)),
            pl.BlockSpec((tk, fc1), lambda k: (k, 0)),
            pl.BlockSpec((1, fc1), lambda k: (0, 0)),
            pl.BlockSpec((fc1, ncls), lambda k: (0, 0)),
            pl.BlockSpec((1, ncls), lambda k: (0, 0)),
        ],
        out_specs=pl.BlockSpec((bsz, ncls), lambda k: (0, 0)),
        scratch_shapes=[pltpu.VMEM((bsz, fc1), jnp.float32)],
        compiler_params=pltpu.CompilerParams(
            dimension_semantics=("arbitrary",),                   # K axis carries the accumulator
            vmem_limit_bytes=vmem_limit),
    )(x, scale, shift, w1_bf16, b1, w2, b2)


# ---------------- parameters ----------------

def init_params(key):
    ks = jax.random.split(key, 4)

    def lin(k, fin, fout, scale=0.1):
        kw, kb = jax.random.split(k)
        w = scale * jax.random.normal(kw, (fin, fout), jnp.float32)   # stored as (in, out)
        b = scale * jax.random.normal(kb, (1, fout), jnp.float32)
        return w, b

    params = {}
    params["edge_fc_w"], params["edge_fc_b"] = lin(ks[0], EMBED_DIM, ENCODE_DIM)
    layers = []
    fin = IN_FEAT
    kl = jax.random.split(ks[1], NUM_LAYERS)
    for i, fout in enumerate(CFG):
        k1, k2, k3, k4 = jax.random.split(kl[i], 4)
        w1, b1 = lin(k1, fin, fout)
        w2, b2 = lin(k2, fin, fout)
        mu = jax.random.normal(k3, (J, ENCODE_DIM), jnp.float32)      # reset_parameters: N(0,1)
        sigma = jax.random.normal(k4, (J, ENCODE_DIM), jnp.float32)
        gamma = jnp.ones((1, fout), jnp.float32)                      # BatchNorm1d default affine
        beta = jnp.zeros((1, fout), jnp.float32)
        layers.append(dict(w1=w1, b1=b1, w2=w2, b2=b2,
                           mu=mu, sigma=sigma, gamma=gamma, beta=beta))
        fin = fout
    params["layers"] = layers
    params["fc1_w"], params["fc1_b"] = lin(ks[2], M * CFG[-1], FC1_DIM)
    params["fc1_w_bf16"] = params["fc1_w"].astype(jnp.bfloat16)       # cast once, streamed in bf16
    params["fc2_w"], params["fc2_b"] = lin(ks[3], FC1_DIM, NUM_CLASSES)
    return params


# ---------------- forward ----------------

@jax.jit
def monet_forward(params, x, maps, L_idx):
    bsz = x.shape[0]

    # --- edge_fc shared across all layers: hoisted, node-major, lane-dense, plus e^2 ---
    e2, e2sq = edge_encode(maps, params["edge_fc_w"], params["edge_fc_b"])   # (M, NN*ENC) x2

    # --- fold per-layer mixture params into block-diagonal (kron) operands (tiny) ---
    sig = jnp.stack([lp["sigma"] for lp in params["layers"]])                # (L, J, ENC)
    mu = jnp.stack([lp["mu"] for lp in params["layers"]])                    # (L, J, ENC)
    sigT = jnp.swapaxes(sig, 1, 2)                                           # (L, ENC, J)
    smT = jnp.swapaxes(sig * mu, 1, 2)                                       # (L, ENC, J)
    eyeN = jnp.eye(NN, dtype=jnp.float32)
    A_all = jax.vmap(lambda s: jnp.kron(eyeN, s))(sigT)                      # (L, NN*ENC, NN*J)
    B_all = jax.vmap(lambda s: jnp.kron(eyeN, s))(smT)                       # (L, NN*ENC, NN*J)
    c_all = jnp.tile(jnp.sum(sig * mu * mu, axis=-1), (1, NN))[:, None, :]   # (L, 1, NN*J)
    S = jnp.kron(eyeN, jnp.ones((J, 1), jnp.float32))                        # (NN*J, NN)

    # --- all layers' neighbor attentions in one pallas_call (grid over layers) ---
    attn_all = attention_all_layers(e2, e2sq, A_all, B_all, c_all, S)        # (L, M, NN)

    # scatter into dense (M, M) adjacency per layer (data-dependent indices -> JAX glue)
    # TODO(synk): at full scale replace dense L + L@x with a scalar-prefetch gather
    #             aggregation (L is ~97% structural zeros at M=1000, NN=32).
    L_all = jax.vmap(
        lambda a: jnp.zeros((M * M,), jnp.float32).at[L_idx].set(a.reshape(-1)).reshape(M, M)
    )(attn_all)                                                              # (L, M, M)

    # --- GCN stack: each layer consumes the previous layer's pre-activation + BN fold ---
    h_pre = jnp.transpose(x, (0, 2, 1))                                      # (B, M, IN_FEAT)
    scale = jnp.ones((1, IN_FEAT), jnp.float32)                              # dummies for layer 0
    shift = jnp.zeros((1, IN_FEAT), jnp.float32)
    apply_act = False
    n = bsz * M
    for i, lp in enumerate(params["layers"]):
        y, psum, psq = gcn_layer(L_all[i], h_pre, scale, shift,
                                 lp["w1"], lp["w2"], lp["b1"] + lp["b2"],
                                 apply_act=apply_act)
        # two-pass BN: per-feature batch statistics from the per-step partial sums
        mean = jnp.sum(psum, axis=0) / n                                     # (1, Fout)
        var = jnp.maximum(jnp.sum(psq, axis=0) / n - mean * mean, 0.0)       # biased var
        scale = lp["gamma"] * jax.lax.rsqrt(var + 1e-5)
        shift = lp["beta"] - mean * scale
        h_pre = y
        apply_act = True
        # dropout = identity (eval)

    # --- last layer's BN + ReLU folded into the MLP head (per-column scale/shift) ---
    C = CFG[-1]
    xflat = h_pre.reshape(bsz, M * C)                                        # (B, M*C)
    scale_flat = jnp.tile(scale, (1, M))                                     # column m*C+c -> scale[c]
    shift_flat = jnp.tile(shift, (1, M))
    return mlp_head(xflat, scale_flat, shift_flat,
                    params["fc1_w_bf16"], params["fc1_b"],
                    params["fc2_w"], params["fc2_b"])


# ---------------- pure-JAX reference (correctness check) ----------------

def reference_forward(params, x, maps, L_idx, fc1_bf16=False):
    h = jnp.transpose(x, (0, 2, 1))
    for lp in params["layers"]:
        e = maps @ params["edge_fc_w"] + params["edge_fc_b"]
        u = e[:, None, :] - lp["mu"][None]
        q = jnp.sum(lp["sigma"][None] * u * u, axis=-1)
        wsum = jnp.sum(jnp.exp(-0.5 * q), axis=-1)
        attn = jax.nn.softmax(wsum.reshape(M, NN), axis=-1)
        L = jnp.zeros((M * M,), jnp.float32).at[L_idx].set(attn.reshape(-1)).reshape(M, M)
        Lx = jnp.einsum("ij,bjf->bif", L, h)
        y = Lx @ lp["w1"] + lp["b1"] + h @ lp["w2"] + lp["b2"]
        mean = jnp.mean(y, axis=(0, 1), keepdims=True)
        var = jnp.mean((y - mean) ** 2, axis=(0, 1), keepdims=True)
        h = jnp.maximum((y - mean) * jax.lax.rsqrt(var + 1e-5) * lp["gamma"] + lp["beta"], 0.0)
    h = h.reshape(x.shape[0], M * CFG[-1])
    if fc1_bf16:
        a = jnp.dot(h.astype(jnp.bfloat16), params["fc1_w"].astype(jnp.bfloat16),
                    preferred_element_type=jnp.float32) + params["fc1_b"]
    else:
        a = h @ params["fc1_w"] + params["fc1_b"]
    h = jnp.maximum(a, 0.0)
    return h @ params["fc2_w"] + params["fc2_b"]


if __name__ == "__main__":
    key = jax.random.PRNGKey(0)
    kp, kx, km = jax.random.split(key, 3)
    params = init_params(kp)

    x = jax.random.normal(kx, (B, IN_FEAT, M), jnp.float32)   # PyTorch-style (B, feat, nodes)
    maps = jax.random.normal(km, (E, EMBED_DIM), jnp.float32)
    # L_idx: for node i, neighbors (i+1 .. i+NN) mod M, flattened indices into (M*M)
    rows = jnp.repeat(jnp.arange(M), NN)
    cols = ((jnp.arange(M)[:, None] + 1 + jnp.arange(NN)[None, :]) % M).reshape(-1)
    L_idx = rows * M + cols

    out = jax.block_until_ready(monet_forward(params, x, maps, L_idx))
    assert out.shape == (B, NUM_CLASSES)

    # Strict check vs a reference that matches the kernel's bf16 fc1 streaming.
    ref_bf16 = reference_forward(params, x, maps, L_idx, fc1_bf16=True)
    if not jnp.allclose(out, ref_bf16, atol=1e-2, rtol=1e-2):
        raise AssertionError("Pallas output mismatches bf16-fc1 reference")
    # Sanity check vs the PyTorch-faithful f32 reference (looser: bf16 weight precision).
    ref_f32 = reference_forward(params, x, maps, L_idx, fc1_bf16=False)
    if not jnp.allclose(out, ref_f32, atol=5e-2, rtol=5e-2):
        raise AssertionError("Pallas output mismatches f32 reference beyond bf16 tolerance")
    print("KERNEL_OK")
</pallas_src>

<mosaic_0001>
module attributes {stable_mosaic.version = 11 : i64} {
  func.func @edge_encode_kernel(%arg0: memref<8x32xf32, #tpu.memory_space<vmem>>, %arg1: memref<32x20xf32, #tpu.memory_space<vmem>>, %arg2: memref<1x20xf32, #tpu.memory_space<vmem>>, %arg3: memref<8x20xf32, #tpu.memory_space<vmem>>, %arg4: memref<8x20xf32, #tpu.memory_space<vmem>>) attributes {dimension_semantics = [], scalar_prefetch = 0 : i64, scratch_operands = 0 : i64, tpu.core_type = #tpu.core_type<tc>} {
    %c0 = arith.constant 0 : index
    %c0_0 = arith.constant 0 : index
    %0 = vector.load %arg0[%c0, %c0_0] : memref<8x32xf32, #tpu.memory_space<vmem>>, vector<8x32xf32>
    %c0_1 = arith.constant 0 : index
    %c0_2 = arith.constant 0 : index
    %1 = vector.load %arg1[%c0_1, %c0_2] : memref<32x20xf32, #tpu.memory_space<vmem>>, vector<32x20xf32>
    %cst = arith.constant dense<0.000000e+00> : vector<8x20xf32>
    %2 = tpu.matmul %0, %1, %cst {dimension_numbers = #tpu.dot_dimension_numbers<[1], [0], [0], [1], [0, 0, 1, 1], [], []>} : vector<8x32xf32>, vector<32x20xf32>, vector<8x20xf32> -> vector<8x20xf32>
    %c0_3 = arith.constant 0 : index
    %c0_4 = arith.constant 0 : index
    %3 = vector.load %arg2[%c0_3, %c0_4] : memref<1x20xf32, #tpu.memory_space<vmem>>, vector<1x20xf32>
    %4 = vector.broadcast %3 : vector<1x20xf32> to vector<8x20xf32>
    %5 = arith.addf %2, %4 : vector<8x20xf32>
    %c0_5 = arith.constant 0 : index
    %c0_6 = arith.constant 0 : index
    %6 = vector.load %arg3[%c0_5, %c0_6] : memref<8x20xf32, #tpu.memory_space<vmem>>, vector<8x20xf32>
    tpu.vector_store %arg3[%c0_5, %c0_6], %5 {strides = array<i32>} : memref<8x20xf32, #tpu.memory_space<vmem>>, vector<8x20xf32>,
    %7 = arith.mulf %5, %5 : vector<8x20xf32>
    %c0_7 = arith.constant 0 : index
    %c0_8 = arith.constant 0 : index
    %8 = vector.load %arg4[%c0_7, %c0_8] : memref<8x20xf32, #tpu.memory_space<vmem>>, vector<8x20xf32>
    tpu.vector_store %arg4[%c0_7, %c0_8], %7 {strides = array<i32>} : memref<8x20xf32, #tpu.memory_space<vmem>>, vector<8x20xf32>,
    return
  }
}

module attributes {stable_mosaic.version = 11 : i64} {
  func.func @attn_kernel(%arg0: i32, %arg1: memref<8x20xf32, #tpu.memory_space<vmem>>, %arg2: memref<8x20xf32, #tpu.memory_space<vmem>>, %arg3: memref<1x20x16xf32, #tpu.memory_space<vmem>>, %arg4: memref<1x20x16xf32, #tpu.memory_space<vmem>>, %arg5: memref<1x1x16xf32, #tpu.memory_space<vmem>>, %arg6: memref<16x4xf32, #tpu.memory_space<vmem>>, %arg7: memref<1x8x4xf32, #tpu.memory_space<vmem>>) attributes {dimension_semantics = [#tpu.dimension_semantics<parallel>], iteration_bounds = array<i64: 5>, scalar_prefetch = 0 : i64, scratch_operands = 0 : i64, tpu.core_type = #tpu.core_type<tc>, window_params = [{pipeline_mode = #tpu.pipeline_mode<synchronous>, transform_indices = @transform_0, window_bounds = array<i64: 8, 20>}, {pipeline_mode = #tpu.pipeline_mode<synchronous>, transform_indices = @transform_1, window_bounds = array<i64: 8, 20>}, {transform_indices = @transform_2, window_bounds = array<i64: 1, 20, 16>}, {transform_indices = @transform_3, window_bounds = array<i64: 1, 20, 16>}, {transform_indices = @transform_4, window_bounds = array<i64: 1, 1, 16>}, {pipeline_mode = #tpu.pipeline_mode<synchronous>, transform_indices = @transform_5, window_bounds = array<i64: 16, 4>}, {transform_indices = @transform_6, window_bounds = array<i64: 1, 8, 4>}]} {
    %c0 = arith.constant 0 : index
    %c0_0 = arith.constant 0 : index
    %0 = vector.load %arg2[%c0, %c0_0] : memref<8x20xf32, #tpu.memory_space<vmem>>, vector<8x20xf32>
    %c0_1 = arith.constant 0 : index
    %c0_2 = arith.constant 0 : index
    %c0_3 = arith.constant 0 : index
    %1 = vector.load %arg3[%c0_1, %c0_2, %c0_3] : memref<1x20x16xf32, #tpu.memory_space<vmem>>, vector<1x20x16xf32>
    %2 = vector.shape_cast %1 : vector<1x20x16xf32> to vector<20x16xf32>
    %cst = arith.constant dense<0.000000e+00> : vector<8x16xf32>
    %3 = tpu.matmul %0, %2, %cst {dimension_numbers = #tpu.dot_dimension_numbers<[1], [0], [0], [1], [0, 0, 1, 1], [], []>} : vector<8x20xf32>, vector<20x16xf32>, vector<8x16xf32> -> vector<8x16xf32>
    %c0_4 = arith.constant 0 : index
    %c0_5 = arith.constant 0 : index
    %4 = vector.load %arg1[%c0_4, %c0_5] : memref<8x20xf32, #tpu.memory_space<vmem>>, vector<8x20xf32>
    %c0_6 = arith.constant 0 : index
    %c0_7 = arith.constant 0 : index
    %c0_8 = arith.constant 0 : index
    %5 = vector.load %arg4[%c0_6, %c0_7, %c0_8] : memref<1x20x16xf32, #tpu.memory_space<vmem>>, vector<1x20x16xf32>
    %6 = vector.shape_cast %5 : vector<1x20x16xf32> to vector<20x16xf32>
    %cst_9 = arith.constant dense<0.000000e+00> : vector<8x16xf32>
    %7 = tpu.matmul %4, %6, %cst_9 {dimension_numbers = #tpu.dot_dimension_numbers<[1], [0], [0], [1], [0, 0, 1, 1], [], []>} : vector<8x20xf32>, vector<20x16xf32>, vector<8x16xf32> -> vector<8x16xf32>
    %cst_10 = arith.constant 2.000000e+00 : f32
    %8 = vector.broadcast %cst_10 : f32 to vector<8x16xf32>
    %9 = arith.mulf %8, %7 : vector<8x16xf32>
    %10 = arith.subf %3, %9 : vector<8x16xf32>
    %c0_11 = arith.constant 0 : index
    %c0_12 = arith.constant 0 : index
    %c0_13 = arith.constant 0 : index
    %11 = vector.load %arg5[%c0_11, %c0_12, %c0_13] : memref<1x1x16xf32, #tpu.memory_space<vmem>>, vector<1x1x16xf32>
    %12 = vector.shape_cast %11 : vector<1x1x16xf32> to vector<1x16xf32>
    %13 = vector.broadcast %12 : vector<1x16xf32> to vector<8x16xf32>
    %14 = arith.addf %10, %13 : vector<8x16xf32>
    %cst_14 = arith.constant -5.000000e-01 : f32
    %15 = vector.broadcast %cst_14 : f32 to vector<8x16xf32>
    %16 = arith.mulf %15, %14 : vector<8x16xf32>
    %17 = math.exp %16 : vector<8x16xf32>
    %c0_15 = arith.constant 0 : index
    %c0_16 = arith.constant 0 : index
    %18 = vector.load %arg6[%c0_15, %c0_16] : memref<16x4xf32, #tpu.memory_space<vmem>>, vector<16x4xf32>
    %cst_17 = arith.constant dense<0.000000e+00> : vector<8x4xf32>
    %19 = tpu.matmul %17, %18, %cst_17 {dimension_numbers = #tpu.dot_dimension_numbers<[1], [0], [0], [1], [0, 0, 1, 1], [], []>} : vector<8x16xf32>, vector<16x4xf32>, vector<8x4xf32> -> vector<8x4xf32>
    %cst_18 = arith.constant dense<0xFF800000> : vector<8xf32>
    %20 = vector.multi_reduction <maximumf>, %19, %cst_18 [1] : vector<8x4xf32> to vector<8xf32>
    %21 = vector.shape_cast %20 : vector<8xf32> to vector<8x1xf32>
    %22 = vector.broadcast %21 : vector<8x1xf32> to vector<8x4xf32>
    %23 = arith.subf %19, %22 : vector<8x4xf32>
    %24 = math.exp %23 : vector<8x4xf32>
    %cst_19 = arith.constant dense<0.000000e+00> : vector<8xf32>
    %25 = vector.multi_reduction <add>, %24, %cst_19 [1] : vector<8x4xf32> to vector<8xf32>
    %26 = vector.shape_cast %25 : vector<8xf32> to vector<8x1xf32>
    %27 = vector.broadcast %26 : vector<8x1xf32> to vector<8x4xf32>
    %28 = arith.divf %24, %27 : vector<8x4xf32>
    %c0_20 = arith.constant 0 : index
    %c0_21 = arith.constant 0 : index
    %c0_22 = arith.constant 0 : index
    %29 = vector.load %arg7[%c0_20, %c0_21, %c0_22] : memref<1x8x4xf32, #tpu.memory_space<vmem>>, vector<1x8x4xf32>
    %30 = vector.shape_cast %29 : vector<1x8x4xf32> to vector<8x4xf32>
    %31 = vector.shape_cast %28 : vector<8x4xf32> to vector<1x8x4xf32>
    tpu.vector_store %arg7[%c0_20, %c0_21, %c0_22], %31 {strides = array<i32>} : memref<1x8x4xf32, #tpu.memory_space<vmem>>, vector<1x8x4xf32>,
    return
  }
  func.func @transform_0(%arg0: i32) -> (i32, i32) {
    %c0_i32 = arith.constant 0 : i32
    %c0_i32_0 = arith.constant 0 : i32
    %c0_i32_1 = arith.constant 0 : i32
    return %c0_i32, %c0_i32_0 : i32, i32
  }
  func.func @transform_1(%arg0: i32) -> (i32, i32) {
    %c0_i32 = arith.constant 0 : i32
    %c0_i32_0 = arith.constant 0 : i32
    %c0_i32_1 = arith.constant 0 : i32
    return %c0_i32, %c0_i32_0 : i32, i32
  }
  func.func @transform_2(%arg0: i32) -> (i32, i32, i32) {
    %c0_i32 = arith.constant 0 : i32
    %c0_i32_0 = arith.constant 0 : i32
    %c0_i32_1 = arith.constant 0 : i32
    return %arg0, %c0_i32, %c0_i32_0 : i32, i32, i32
  }
  func.func @transform_3(%arg0: i32) -> (i32, i32, i32) {
    %c0_i32 = arith.constant 0 : i32
    %c0_i32_0 = arith.constant 0 : i32
    %c0_i32_1 = arith.constant 0 : i32
    return %arg0, %c0_i32, %c0_i32_0 : i32, i32, i32
  }
  func.func @transform_4(%arg0: i32) -> (i32, i32, i32) {
    %c0_i32 = arith.constant 0 : i32
    %c0_i32_0 = arith.constant 0 : i32
    %c0_i32_1 = arith.constant 0 : i32
    return %arg0, %c0_i32, %c0_i32_0 : i32, i32, i32
  }
  func.func @transform_5(%arg0: i32) -> (i32, i32) {
    %c0_i32 = arith.constant 0 : i32
    %c0_i32_0 = arith.constant 0 : i32
    %c0_i32_1 = arith.constant 0 : i32
    return %c0_i32, %c0_i32_0 : i32, i32
  }
  func.func @transform_6(%arg0: i32) -> (i32, i32, i32) {
    %c0_i32 = arith.constant 0 : i32
    %c0_i32_0 = arith.constant 0 : i32
    %c0_i32_1 = arith.constant 0 : i32
    return %arg0, %c0_i32, %c0_i32_0 : i32, i32, i32
  }
}

module attributes {stable_mosaic.version = 11 : i64} {
  func.func @gcn_layer_kernel(%arg0: i32, %arg1: memref<8x8xf32, #tpu.memory_space<vmem>>, %arg2: memref<1x8x16xf32, #tpu.memory_space<vmem>>, %arg3: memref<1x16xf32, #tpu.memory_space<vmem>>, %arg4: memref<1x16xf32, #tpu.memory_space<vmem>>, %arg5: memref<16x32xf32, #tpu.memory_space<vmem>>, %arg6: memref<16x32xf32, #tpu.memory_space<vmem>>, %arg7: memref<1x32xf32, #tpu.memory_space<vmem>>, %arg8: memref<1x8x32xf32, #tpu.memory_space<vmem>>, %arg9: memref<1x1x32xf32, #tpu.memory_space<vmem>>, %arg10: memref<1x1x32xf32, #tpu.memory_space<vmem>>) attributes {dimension_semantics = [#tpu.dimension_semantics<parallel>], iteration_bounds = array<i64: 2>, scalar_prefetch = 0 : i64, scratch_operands = 0 : i64, tpu.core_type = #tpu.core_type<tc>, window_params = [{pipeline_mode = #tpu.pipeline_mode<synchronous>, transform_indices = @transform_0, window_bounds = array<i64: 8, 8>}, {transform_indices = @transform_1, window_bounds = array<i64: 1, 8, 16>}, {pipeline_mode = #tpu.pipeline_mode<synchronous>, transform_indices = @transform_2, window_bounds = array<i64: 1, 16>}, {pipeline_mode = #tpu.pipeline_mode<synchronous>, transform_indices = @transform_3, window_bounds = array<i64: 1, 16>}, {pipeline_mode = #tpu.pipeline_mode<synchronous>, transform_indices = @transform_4, window_bounds = array<i64: 16, 32>}, {pipeline_mode = #tpu.pipeline_mode<synchronous>, transform_indices = @transform_5, window_bounds = array<i64: 16, 32>}, {pipeline_mode = #tpu.pipeline_mode<synchronous>, transform_indices = @transform_6, window_bounds = array<i64: 1, 32>}, {transform_indices = @transform_7, window_bounds = array<i64: 1, 8, 32>}, {transform_indices = @transform_8, window_bounds = array<i64: 1, 1, 32>}, {transform_indices = @transform_9, window_bounds = array<i64: 1, 1, 32>}]} {
    %c0 = arith.constant 0 : index
    %c0_0 = arith.constant 0 : index
    %c0_1 = arith.constant 0 : index
    %0 = vector.load %arg2[%c0, %c0_0, %c0_1] : memref<1x8x16xf32, #tpu.memory_space<vmem>>, vector<1x8x16xf32>
    %1 = vector.shape_cast %0 : vector<1x8x16xf32> to vector<8x16xf32>
    %c0_2 = arith.constant 0 : index
    %c0_3 = arith.constant 0 : index
    %2 = vector.load %arg1[%c0_2, %c0_3] : memref<8x8xf32, #tpu.memory_space<vmem>>, vector<8x8xf32>
    %cst = arith.constant dense<0.000000e+00> : vector<8x16xf32>
    %3 = tpu.matmul %2, %1, %cst {dimension_numbers = #tpu.dot_dimension_numbers<[1], [0], [0], [1], [0, 0, 1, 1], [], []>} : vector<8x8xf32>, vector<8x16xf32>, vector<8x16xf32> -> vector<8x16xf32>
    %c0_4 = arith.constant 0 : index
    %c0_5 = arith.constant 0 : index
    %4 = vector.load %arg5[%c0_4, %c0_5] : memref<16x32xf32, #tpu.memory_space<vmem>>, vector<16x32xf32>
    %cst_6 = arith.constant dense<0.000000e+00> : vector<8x32xf32>
    %5 = tpu.matmul %3, %4, %cst_6 {dimension_numbers = #tpu.dot_dimension_numbers<[1], [0], [0], [1], [0, 0, 1, 1], [], []>} : vector<8x16xf32>, vector<16x32xf32>, vector<8x32xf32> -> vector<8x32xf32>
    %c0_7 = arith.constant 0 : index
    %c0_8 = arith.constant 0 : index
    %6 = vector.load %arg6[%c0_7, %c0_8] : memref<16x32xf32, #tpu.memory_space<vmem>>, vector<16x32xf32>
    %cst_9 = arith.constant dense<0.000000e+00> : vector<8x32xf32>
    %7 = tpu.matmul %1, %6, %cst_9 {dimension_numbers = #tpu.dot_dimension_numbers<[1], [0], [0], [1], [0, 0, 1, 1], [], []>} : vector<8x16xf32>, vector<16x32xf32>, vector<8x32xf32> -> vector<8x32xf32>
    %8 = arith.addf %5, %7 : vector<8x32xf32>
    %c0_10 = arith.constant 0 : index
    %c0_11 = arith.constant 0 : index
    %9 = vector.load %arg7[%c0_10, %c0_11] : memref<1x32xf32, #tpu.memory_space<vmem>>, vector<1x32xf32>
    %10 = vector.broadcast %9 : vector<1x32xf32> to vector<8x32xf32>
    %11 = arith.addf %8, %10 : vector<8x32xf32>
    %c0_12 = arith.constant 0 : index
    %c0_13 = arith.constant 0 : index
    %c0_14 = arith.constant 0 : index
    %12 = vector.load %arg8[%c0_12, %c0_13, %c0_14] : memref<1x8x32xf32, #tpu.memory_space<vmem>>, vector<1x8x32xf32>
    %13 = vector.shape_cast %12 : vector<1x8x32xf32> to vector<8x32xf32>
    %14 = vector.shape_cast %11 : vector<8x32xf32> to vector<1x8x32xf32>
    tpu.vector_store %arg8[%c0_12, %c0_13, %c0_14], %14 {strides = array<i32>} : memref<1x8x32xf32, #tpu.memory_space<vmem>>, vector<1x8x32xf32>,
    %cst_15 = arith.constant dense<0.000000e+00> : vector<32xf32>
    %15 = vector.multi_reduction <add>, %11, %cst_15 [0] : vector<8x32xf32> to vector<32xf32>
    %16 = vector.shape_cast %15 : vector<32xf32> to vector<1x32xf32>
    %c0_16 = arith.constant 0 : index
    %c0_17 = arith.constant 0 : index
    %c0_18 = arith.constant 0 : index
    %17 = vector.load %arg9[%c0_16, %c0_17, %c0_18] : memref<1x1x32xf32, #tpu.memory_space<vmem>>, vector<1x1x32xf32>
    %18 = vector.shape_cast %17 : vector<1x1x32xf32> to vector<1x32xf32>
    %19 = vector.shape_cast %16 : vector<1x32xf32> to vector<1x1x32xf32>
    tpu.vector_store %arg9[%c0_16, %c0_17, %c0_18], %19 {strides = array<i32>} : memref<1x1x32xf32, #tpu.memory_space<vmem>>, vector<1x1x32xf32>,
    %20 = arith.mulf %11, %11 : vector<8x32xf32>
    %cst_19 = arith.constant dense<0.000000e+00> : vector<32xf32>
    %21 = vector.multi_reduction <add>, %20, %cst_19 [0] : vector<8x32xf32> to vector<32xf32>
    %22 = vector.shape_cast %21 : vector<32xf32> to vector<1x32xf32>
    %c0_20 = arith.constant 0 : index
    %c0_21 = arith.constant 0 : index
    %c0_22 = arith.constant 0 : index
    %23 = vector.load %arg10[%c0_20, %c0_21, %c0_22] : memref<1x1x32xf32, #tpu.memory_space<vmem>>, vector<1x1x32xf32>
    %24 = vector.shape_cast %23 : vector<1x1x32xf32> to vector<1x32xf32>
    %25 = vector.shape_cast %22 : vector<1x32xf32> to vector<1x1x32xf32>
    tpu.vector_store %arg10[%c0_20, %c0_21, %c0_22], %25 {strides = array<i32>} : memref<1x1x32xf32, #tpu.memory_space<vmem>>, vector<1x1x32xf32>,
    return
  }
  func.func @transform_0(%arg0: i32) -> (i32, i32) {
    %c0_i32 = arith.constant 0 : i32
    %c0_i32_0 = arith.constant 0 : i32
    %c0_i32_1 = arith.constant 0 : i32
    return %c0_i32, %c0_i32_0 : i32, i32
  }
  func.func @transform_1(%arg0: i32) -> (i32, i32, i32) {
    %c0_i32 = arith.constant 0 : i32
    %c0_i32_0 = arith.constant 0 : i32
    %c0_i32_1 = arith.constant 0 : i32
    return %arg0, %c0_i32, %c0_i32_0 : i32, i32, i32
  }
  func.func @transform_2(%arg0: i32) -> (i32, i32) {
    %c0_i32 = arith.constant 0 : i32
    %c0_i32_0 = arith.constant 0 : i32
    %c0_i32_1 = arith.constant 0 : i32
    return %c0_i32, %c0_i32_0 : i32, i32
  }
  func.func @transform_3(%arg0: i32) -> (i32, i32) {
    %c0_i32 = arith.constant 0 : i32
    %c0_i32_0 = arith.constant 0 : i32
    %c0_i32_1 = arith.constant 0 : i32
    return %c0_i32, %c0_i32_0 : i32, i32
  }
  func.func @transform_4(%arg0: i32) -> (i32, i32) {
    %c0_i32 = arith.constant 0 : i32
    %c0_i32_0 = arith.constant 0 : i32
    %c0_i32_1 = arith.constant 0 : i32
    return %c0_i32, %c0_i32_0 : i32, i32
  }
  func.func @transform_5(%arg0: i32) -> (i32, i32) {
    %c0_i32 = arith.constant 0 : i32
    %c0_i32_0 = arith.constant 0 : i32
    %c0_i32_1 = arith.constant 0 : i32
    return %c0_i32, %c0_i32_0 : i32, i32
  }
  func.func @transform_6(%arg0: i32) -> (i32, i32) {
    %c0_i32 = arith.constant 0 : i32
    %c0_i32_0 = arith.constant 0 : i32
    %c0_i32_1 = arith.constant 0 : i32
    return %c0_i32, %c0_i32_0 : i32, i32
  }
  func.func @transform_7(%arg0: i32) -> (i32, i32, i32) {
    %c0_i32 = arith.constant 0 : i32
    %c0_i32_0 = arith.constant 0 : i32
    %c0_i32_1 = arith.constant 0 : i32
    return %arg0, %c0_i32, %c0_i32_0 : i32, i32, i32
  }
  func.func @transform_8(%arg0: i32) -> (i32, i32, i32) {
    %c0_i32 = arith.constant 0 : i32
    %c0_i32_0 = arith.constant 0 : i32
    %c0_i32_1 = arith.constant 0 : i32
    return %arg0, %c0_i32, %c0_i32_0 : i32, i32, i32
  }
  func.func @transform_9(%arg0: i32) -> (i32, i32, i32) {
    %c0_i32 = arith.constant 0 : i32
    %c0_i32_0 = arith.constant 0 : i32
    %c0_i32_1 = arith.constant 0 : i32
    return %arg0, %c0_i32, %c0_i32_0 : i32, i32, i32
  }
}

module attributes {stable_mosaic.version = 11 : i64} {
  func.func @gcn_layer_kernel(%arg0: i32, %arg1: memref<8x8xf32, #tpu.memory_space<vmem>>, %arg2: memref<1x8x32xf32, #tpu.memory_space<vmem>>, %arg3: memref<1x32xf32, #tpu.memory_space<vmem>>, %arg4: memref<1x32xf32, #tpu.memory_space<vmem>>, %arg5: memref<32x32xf32, #tpu.memory_space<vmem>>, %arg6: memref<32x32xf32, #tpu.memory_space<vmem>>, %arg7: memref<1x32xf32, #tpu.memory_space<vmem>>, %arg8: memref<1x8x32xf32, #tpu.memory_space<vmem>>, %arg9: memref<1x1x32xf32, #tpu.memory_space<vmem>>, %arg10: memref<1x1x32xf32, #tpu.memory_space<vmem>>) attributes {dimension_semantics = [#tpu.dimension_semantics<parallel>], iteration_bounds = array<i64: 2>, scalar_prefetch = 0 : i64, scratch_operands = 0 : i64, tpu.core_type = #tpu.core_type<tc>, window_params = [{pipeline_mode = #tpu.pipeline_mode<synchronous>, transform_indices = @transform_0, window_bounds = array<i64: 8, 8>}, {transform_indices = @transform_1, window_bounds = array<i64: 1, 8, 32>}, {pipeline_mode = #tpu.pipeline_mode<synchronous>, transform_indices = @transform_2, window_bounds = array<i64: 1, 32>}, {pipeline_mode = #tpu.pipeline_mode<synchronous>, transform_indices = @transform_3, window_bounds = array<i64: 1, 32>}, {pipeline_mode = #tpu.pipeline_mode<synchronous>, transform_indices = @transform_4, window_bounds = array<i64: 32, 32>}, {pipeline_mode = #tpu.pipeline_mode<synchronous>, transform_indices = @transform_5, window_bounds = array<i64: 32, 32>}, {pipeline_mode = #tpu.pipeline_mode<synchronous>, transform_indices = @transform_6, window_bounds = array<i64: 1, 32>}, {transform_indices = @transform_7, window_bounds = array<i64: 1, 8, 32>}, {transform_indices = @transform_8, window_bounds = array<i64: 1, 1, 32>}, {transform_indices = @transform_9, window_bounds = array<i64: 1, 1, 32>}]} {
    %c0 = arith.constant 0 : index
    %c0_0 = arith.constant 0 : index
    %c0_1 = arith.constant 0 : index
    %0 = vector.load %arg2[%c0, %c0_0, %c0_1] : memref<1x8x32xf32, #tpu.memory_space<vmem>>, vector<1x8x32xf32>
    %1 = vector.shape_cast %0 : vector<1x8x32xf32> to vector<8x32xf32>
    %c0_2 = arith.constant 0 : index
    %c0_3 = arith.constant 0 : index
    %2 = vector.load %arg3[%c0_2, %c0_3] : memref<1x32xf32, #tpu.memory_space<vmem>>, vector<1x32xf32>
    %3 = vector.broadcast %2 : vector<1x32xf32> to vector<8x32xf32>
    %4 = arith.mulf %1, %3 : vector<8x32xf32>
    %c0_4 = arith.constant 0 : index
    %c0_5 = arith.constant 0 : index
    %5 = vector.load %arg4[%c0_4, %c0_5] : memref<1x32xf32, #tpu.memory_space<vmem>>, vector<1x32xf32>
    %6 = vector.broadcast %5 : vector<1x32xf32> to vector<8x32xf32>
    %7 = arith.addf %4, %6 : vector<8x32xf32>
    %cst = arith.constant 0.000000e+00 : f32
    %8 = vector.broadcast %cst : f32 to vector<8x32xf32>
    %9 = arith.maximumf %7, %8 : vector<8x32xf32>
    %c0_6 = arith.constant 0 : index
    %c0_7 = arith.constant 0 : index
    %10 = vector.load %arg1[%c0_6, %c0_7] : memref<8x8xf32, #tpu.memory_space<vmem>>, vector<8x8xf32>
    %cst_8 = arith.constant dense<0.000000e+00> : vector<8x32xf32>
    %11 = tpu.matmul %10, %9, %cst_8 {dimension_numbers = #tpu.dot_dimension_numbers<[1], [0], [0], [1], [0, 0, 1, 1], [], []>} : vector<8x8xf32>, vector<8x32xf32>, vector<8x32xf32> -> vector<8x32xf32>
    %c0_9 = arith.constant 0 : index
    %c0_10 = arith.constant 0 : index
    %12 = vector.load %arg5[%c0_9, %c0_10] : memref<32x32xf32, #tpu.memory_space<vmem>>, vector<32x32xf32>
    %cst_11 = arith.constant dense<0.000000e+00> : vector<8x32xf32>
    %13 = tpu.matmul %11, %12, %cst_11 {dimension_numbers = #tpu.dot_dimension_numbers<[1], [0], [0], [1], [0, 0, 1, 1], [], []>} : vector<8x32xf32>, vector<32x32xf32>, vector<8x32xf32> -> vector<8x32xf32>
    %c0_12 = arith.constant 0 : index
    %c0_13 = arith.constant 0 : index
    %14 = vector.load %arg6[%c0_12, %c0_13] : memref<32x32xf32, #tpu.memory_space<vmem>>, vector<32x32xf32>
    %cst_14 = arith.constant dense<0.000000e+00> : vector<8x32xf32>
    %15 = tpu.matmul %9, %14, %cst_14 {dimension_numbers = #tpu.dot_dimension_numbers<[1], [0], [0], [1], [0, 0, 1, 1], [], []>} : vector<8x32xf32>, vector<32x32xf32>, vector<8x32xf32> -> vector<8x32xf32>
    %16 = arith.addf %13, %15 : vector<8x32xf32>
    %c0_15 = arith.constant 0 : index
    %c0_16 = arith.constant 0 : index
    %17 = vector.load %arg7[%c0_15, %c0_16] : memref<1x32xf32, #tpu.memory_space<vmem>>, vector<1x32xf32>
    %18 = vector.broadcast %17 : vector<1x32xf32> to vector<8x32xf32>
    %19 = arith.addf %16, %18 : vector<8x32xf32>
    %c0_17 = arith.constant 0 : index
    %c0_18 = arith.constant 0 : index
    %c0_19 = arith.constant 0 : index
    %20 = vector.load %arg8[%c0_17, %c0_18, %c0_19] : memref<1x8x32xf32, #tpu.memory_space<vmem>>, vector<1x8x32xf32>
    %21 = vector.shape_cast %20 : vector<1x8x32xf32> to vector<8x32xf32>
    %22 = vector.shape_cast %19 : vector<8x32xf32> to vector<1x8x32xf32>
    tpu.vector_store %arg8[%c0_17, %c0_18, %c0_19], %22 {strides = array<i32>} : memref<1x8x32xf32, #tpu.memory_space<vmem>>, vector<1x8x32xf32>,
    %cst_20 = arith.constant dense<0.000000e+00> : vector<32xf32>
    %23 = vector.multi_reduction <add>, %19, %cst_20 [0] : vector<8x32xf32> to vector<32xf32>
    %24 = vector.shape_cast %23 : vector<32xf32> to vector<1x32xf32>
    %c0_21 = arith.constant 0 : index
    %c0_22 = arith.constant 0 : index
    %c0_23 = arith.constant 0 : index
    %25 = vector.load %arg9[%c0_21, %c0_22, %c0_23] : memref<1x1x32xf32, #tpu.memory_space<vmem>>, vector<1x1x32xf32>
    %26 = vector.shape_cast %25 : vector<1x1x32xf32> to vector<1x32xf32>
    %27 = vector.shape_cast %24 : vector<1x32xf32> to vector<1x1x32xf32>
    tpu.vector_store %arg9[%c0_21, %c0_22, %c0_23], %27 {strides = array<i32>} : memref<1x1x32xf32, #tpu.memory_space<vmem>>, vector<1x1x32xf32>,
    %28 = arith.mulf %19, %19 : vector<8x32xf32>
    %cst_24 = arith.constant dense<0.000000e+00> : vector<32xf32>
    %29 = vector.multi_reduction <add>, %28, %cst_24 [0] : vector<8x32xf32> to vector<32xf32>
    %30 = vector.shape_cast %29 : vector<32xf32> to vector<1x32xf32>
    %c0_25 = arith.constant 0 : index
    %c0_26 = arith.constant 0 : index
    %c0_27 = arith.constant 0 : index
    %31 = vector.load %arg10[%c0_25, %c0_26, %c0_27] : memref<1x1x32xf32, #tpu.memory_space<vmem>>, vector<1x1x32xf32>
    %32 = vector.shape_cast %31 : vector<1x1x32xf32> to vector<1x32xf32>
    %33 = vector.shape_cast %30 : vector<1x32xf32> to vector<1x1x32xf32>
    tpu.vector_store %arg10[%c0_25, %c0_26, %c0_27], %33 {strides = array<i32>} : memref<1x1x32xf32, #tpu.memory_space<vmem>>, vector<1x1x32xf32>,
    return
  }
  func.func @transform_0(%arg0: i32) -> (i32, i32) {
    %c0_i32 = arith.constant 0 : i32
    %c0_i32_0 = arith.constant 0 : i32
    %c0_i32_1 = arith.constant 0 : i32
    return %c0_i32, %c0_i32_0 : i32, i32
  }
  func.func @transform_1(%arg0: i32) -> (i32, i32, i32) {
    %c0_i32 = arith.constant 0 : i32
    %c0_i32_0 = arith.constant 0 : i32
    %c0_i32_1 = arith.constant 0 : i32
    return %arg0, %c0_i32, %c0_i32_0 : i32, i32, i32
  }
  func.func @transform_2(%arg0: i32) -> (i32, i32) {
    %c0_i32 = arith.constant 0 : i32
    %c0_i32_0 = arith.constant 0 : i32
    %c0_i32_1 = arith.constant 0 : i32
    return %c0_i32, %c0_i32_0 : i32, i32
  }
  func.func @transform_3(%arg0: i32) -> (i32, i32) {
    %c0_i32 = arith.constant 0 : i32
    %c0_i32_0 = arith.constant 0 : i32
    %c0_i32_1 = arith.constant 0 : i32
    return %c0_i32, %c0_i32_0 : i32, i32
  }
  func.func @transform_4(%arg0: i32) -> (i32, i32) {
    %c0_i32 = arith.constant 0 : i32
    %c0_i32_0 = arith.constant 0 : i32
    %c0_i32_1 = arith.constant 0 : i32
    return %c0_i32, %c0_i32_0 : i32, i32
  }
  func.func @transform_5(%arg0: i32) -> (i32, i32) {
    %c0_i32 = arith.constant 0 : i32
    %c0_i32_0 = arith.constant 0 : i32
    %c0_i32_1 = arith.constant 0 : i32
    return %c0_i32, %c0_i32_0 : i32, i32
  }
  func.func @transform_6(%arg0: i32) -> (i32, i32) {
    %c0_i32 = arith.constant 0 : i32
    %c0_i32_0 = arith.constant 0 : i32
    %c0_i32_1 = arith.constant 0 : i32
    return %c0_i32, %c0_i32_0 : i32, i32
  }
  func.func @transform_7(%arg0: i32) -> (i32, i32, i32) {
    %c0_i32 = arith.constant 0 : i32
    %c0_i32_0 = arith.constant 0 : i32
    %c0_i32_1 = arith.constant 0 : i32
    return %arg0, %c0_i32, %c0_i32_0 : i32, i32, i32
  }
  func.func @transform_8(%arg0: i32) -> (i32, i32, i32) {
    %c0_i32 = arith.constant 0 : i32
    %c0_i32_0 = arith.constant 0 : i32
    %c0_i32_1 = arith.constant 0 : i32
    return %arg0, %c0_i32, %c0_i32_0 : i32, i32, i32
  }
  func.func @transform_9(%arg0: i32) -> (i32, i32, i32) {
    %c0_i32 = arith.constant 0 : i32
    %c0_i32_0 = arith.constant 0 : i32
    %c0_i32_1 = arith.constant 0 : i32
    return %arg0, %c0_i32, %c0_i32_0 : i32, i32, i32
  }
}

module attributes {stable_mosaic.version = 11 : i64} {
  func.func @mlp_head_kernel(%arg0: i32, %arg1: memref<2x128xf32, #tpu.memory_space<vmem>>, %arg2: memref<1x128xf32, #tpu.memory_space<vmem>>, %arg3: memref<1x128xf32, #tpu.memory_space<vmem>>, %arg4: memref<128x64xbf16, #tpu.memory_space<vmem>>, %arg5: memref<1x64xf32, #tpu.memory_space<vmem>>, %arg6: memref<64x20xf32, #tpu.memory_space<vmem>>, %arg7: memref<1x20xf32, #tpu.memory_space<vmem>>, %arg8: memref<2x20xf32, #tpu.memory_space<vmem>>, %arg9: memref<2x64xf32, #tpu.memory_space<vmem>>) attributes {dimension_semantics = [#tpu.dimension_semantics<arbitrary>], iteration_bounds = array<i64: 2>, scalar_prefetch = 0 : i64, scratch_operands = 1 : i64, tpu.core_type = #tpu.core_type<tc>, window_params = [{transform_indices = @transform_0, window_bounds = array<i64: 2, 128>}, {transform_indices = @transform_1, window_bounds = array<i64: 1, 128>}, {transform_indices = @transform_2, window_bounds = array<i64: 1, 128>}, {transform_indices = @transform_3, window_bounds = array<i64: 128, 64>}, {pipeline_mode = #tpu.pipeline_mode<synchronous>, transform_indices = @transform_4, window_bounds = array<i64: 1, 64>}, {pipeline_mode = #tpu.pipeline_mode<synchronous>, transform_indices = @transform_5, window_bounds = array<i64: 64, 20>}, {pipeline_mode = #tpu.pipeline_mode<synchronous>, transform_indices = @transform_6, window_bounds = array<i64: 1, 20>}, {pipeline_mode = #tpu.pipeline_mode<synchronous>, transform_indices = @transform_7, window_bounds = array<i64: 2, 20>}]} {
    %c0_i32 = arith.constant 0 : i32
    %0 = arith.cmpi eq, %arg0, %c0_i32 : i32
    %1 = arith.extui %0 : i1 to i32
    %c0_i32_0 = arith.constant 0 : i32
    %2 = arith.cmpi ne, %1, %c0_i32_0 : i32
    scf.if %2 {
      %cst_14 = arith.constant 0.000000e+00 : f32
      %21 = vector.broadcast %cst_14 : f32 to vector<2x64xf32>
      %c0_15 = arith.constant 0 : index
      %c0_16 = arith.constant 0 : index
      %22 = vector.load %arg9[%c0_15, %c0_16] : memref<2x64xf32, #tpu.memory_space<vmem>>, vector<2x64xf32>
      tpu.vector_store %arg9[%c0_15, %c0_16], %21 {strides = array<i32>} : memref<2x64xf32, #tpu.memory_space<vmem>>, vector<2x64xf32>,
    } else {
    }
    %c0 = arith.constant 0 : index
    %c0_1 = arith.constant 0 : index
    %3 = vector.load %arg1[%c0, %c0_1] : memref<2x128xf32, #tpu.memory_space<vmem>>, vector<2x128xf32>
    %c0_2 = arith.constant 0 : index
    %c0_3 = arith.constant 0 : index
    %4 = vector.load %arg2[%c0_2, %c0_3] : memref<1x128xf32, #tpu.memory_space<vmem>>, vector<1x128xf32>
    %5 = vector.broadcast %4 : vector<1x128xf32> to vector<2x128xf32>
    %6 = arith.mulf %3, %5 : vector<2x128xf32>
    %c0_4 = arith.constant 0 : index
    %c0_5 = arith.constant 0 : index
    %7 = vector.load %arg3[%c0_4, %c0_5] : memref<1x128xf32, #tpu.memory_space<vmem>>, vector<1x128xf32>
    %8 = vector.broadcast %7 : vector<1x128xf32> to vector<2x128xf32>
    %9 = arith.addf %6, %8 : vector<2x128xf32>
    %cst = arith.constant 0.000000e+00 : f32
    %10 = vector.broadcast %cst : f32 to vector<2x128xf32>
    %11 = arith.maximumf %9, %10 : vector<2x128xf32>
    %c0_6 = arith.constant 0 : index
    %c0_7 = arith.constant 0 : index
    %12 = vector.load %arg9[%c0_6, %c0_7] : memref<2x64xf32, #tpu.memory_space<vmem>>, vector<2x64xf32>
    %13 = arith.truncf %11 : vector<2x128xf32> to vector<2x128xbf16>
    %c0_8 = arith.constant 0 : index
    %c0_9 = arith.constant 0 : index
    %14 = vector.load %arg4[%c0_8, %c0_9] : memref<128x64xbf16, #tpu.memory_space<vmem>>, vector<128x64xbf16>
    %cst_10 = arith.constant dense<0.000000e+00> : vector<2x64xf32>
    %15 = tpu.matmul %13, %14, %cst_10 {dimension_numbers = #tpu.dot_dimension_numbers<[1], [0], [0], [1], [0, 0, 1, 1], [], []>} : vector<2x128xbf16>, vector<128x64xbf16>, vector<2x64xf32> -> vector<2x64xf32>
    %16 = arith.addf %12, %15 : vector<2x64xf32>
    %c0_11 = arith.constant 0 : index
    %c0_12 = arith.constant 0 : index
    %17 = vector.load %arg9[%c0_11, %c0_12] : memref<2x64xf32, #tpu.memory_space<vmem>>, vector<2x64xf32>
    tpu.vector_store %arg9[%c0_11, %c0_12], %16 {strides = array<i32>} : memref<2x64xf32, #tpu.memory_space<vmem>>, vector<2x64xf32>,
    %c1_i32 = arith.constant 1 : i32
    %18 = arith.cmpi eq, %arg0, %c1_i32 : i32
    %19 = arith.extui %18 : i1 to i32
    %c0_i32_13 = arith.constant 0 : i32
    %20 = arith.cmpi ne, %19, %c0_i32_13 : i32
    scf.if %20 {
      %c0_14 = arith.constant 0 : index
      %c0_15 = arith.constant 0 : index
      %21 = vector.load %arg9[%c0_14, %c0_15] : memref<2x64xf32, #tpu.memory_space<vmem>>, vector<2x64xf32>
      %c0_16 = arith.constant 0 : index
      %c0_17 = arith.constant 0 : index
      %22 = vector.load %arg5[%c0_16, %c0_17] : memref<1x64xf32, #tpu.memory_space<vmem>>, vector<1x64xf32>
      %23 = vector.broadcast %22 : vector<1x64xf32> to vector<2x64xf32>
      %24 = arith.addf %21, %23 : vector<2x64xf32>
      %cst_18 = arith.constant 0.000000e+00 : f32
      %25 = vector.broadcast %cst_18 : f32 to vector<2x64xf32>
      %26 = arith.maximumf %24, %25 : vector<2x64xf32>
      %c0_19 = arith.constant 0 : index
      %c0_20 = arith.constant 0 : index
      %27 = vector.load %arg6[%c0_19, %c0_20] : memref<64x20xf32, #tpu.memory_space<vmem>>, vector<64x20xf32>
      %cst_21 = arith.constant dense<0.000000e+00> : vector<2x20xf32>
      %28 = tpu.matmul %26, %27, %cst_21 {dimension_numbers = #tpu.dot_dimension_numbers<[1], [0], [0], [1], [0, 0, 1, 1], [], []>} : vector<2x64xf32>, vector<64x20xf32>, vector<2x20xf32> -> vector<2x20xf32>
      %c0_22 = arith.constant 0 : index
      %c0_23 = arith.constant 0 : index
      %29 = vector.load %arg7[%c0_22, %c0_23] : memref<1x20xf32, #tpu.memory_space<vmem>>, vector<1x20xf32>
      %30 = vector.broadcast %29 : vector<1x20xf32> to vector<2x20xf32>
      %31 = arith.addf %28, %30 : vector<2x20xf32>
      %c0_24 = arith.constant 0 : index
      %c0_25 = arith.constant 0 : index
      %32 = vector.load %arg8[%c0_24, %c0_25] : memref<2x20xf32, #tpu.memory_space<vmem>>, vector<2x20xf32>
      tpu.vector_store %arg8[%c0_24, %c0_25], %31 {strides = array<i32>} : memref<2x20xf32, #tpu.memory_space<vmem>>, vector<2x20xf32>,
    } else {
    }
    return
  }
  func.func @transform_0(%arg0: i32) -> (i32, i32) {
    %c0_i32 = arith.constant 0 : i32
    %c0_i32_0 = arith.constant 0 : i32
    return %c0_i32, %arg0 : i32, i32
  }
  func.func @transform_1(%arg0: i32) -> (i32, i32) {
    %c0_i32 = arith.constant 0 : i32
    %c0_i32_0 = arith.constant 0 : i32
    return %c0_i32, %arg0 : i32, i32
  }
  func.func @transform_2(%arg0: i32) -> (i32, i32) {
    %c0_i32 = arith.constant 0 : i32
    %c0_i32_0 = arith.constant 0 : i32
    return %c0_i32, %arg0 : i32, i32
  }
  func.func @transform_3(%arg0: i32) -> (i32, i32) {
    %c0_i32 = arith.constant 0 : i32
    %c0_i32_0 = arith.constant 0 : i32
    return %arg0, %c0_i32 : i32, i32
  }
  func.func @transform_4(%arg0: i32) -> (i32, i32) {
    %c0_i32 = arith.constant 0 : i32
    %c0_i32_0 = arith.constant 0 : i32
    %c0_i32_1 = arith.constant 0 : i32
    return %c0_i32, %c0_i32_0 : i32, i32
  }
  func.func @transform_5(%arg0: i32) -> (i32, i32) {
    %c0_i32 = arith.constant 0 : i32
    %c0_i32_0 = arith.constant 0 : i32
    %c0_i32_1 = arith.constant 0 : i32
    return %c0_i32, %c0_i32_0 : i32, i32
  }
  func.func @transform_6(%arg0: i32) -> (i32, i32) {
    %c0_i32 = arith.constant 0 : i32
    %c0_i32_0 = arith.constant 0 : i32
    %c0_i32_1 = arith.constant 0 : i32
    return %c0_i32, %c0_i32_0 : i32, i32
  }
  func.func @transform_7(%arg0: i32) -> (i32, i32) {
    %c0_i32 = arith.constant 0 : i32
    %c0_i32_0 = arith.constant 0 : i32
    %c0_i32_1 = arith.constant 0 : i32
    return %c0_i32, %c0_i32_0 : i32, i32
  }
}

</mosaic_0001>

<bundles_post_ra>
// kernel: squeeze.5
= control target key start
LH: loop header
LB: loop body
LE: loop exit
PB: predicated region body
PF: predicated region fallthrough
CT: control target
= control target key end

     0   :  { %s66_s8 = smov 104   ;;  %vm7_vm0 = vcmask 64512   ;;  %s67_s11 = smov 112   ;;  %s117_s0 = inlined_call_operand.vmem [shape: f32[64], index: 0, kind: input, shape index: {}]   ;;  %s118_s1 = inlined_call_operand.vmem [shape: f32[8,8], index: 1, kind: output, shape index: {}]  }
   0x1   :  { %v4_v0 = vld [vmem:[%s117_s0] sm:$0x1]  ;;  %s65_s0 = smov 120   ;;  %s68_s12 = smov 96  }
   0x2   :  { %5 = vst [vmem:[#allocation0] sm:$0x1] %v4_v0  ;;  %s69_s13 = smov 88   ;;  %s70_s14 = smov 80  }
   0x3   :  { %s71_s15 = smov 72  }
   0x9   :  { %v9_v1 = vld [vmem:[#allocation0] sm:$0x1]  }
   0xa   :  { %v21_v2 = vld [vmem:[#allocation0] sm:$0x1]   ;;  %10 = vrot.lane.b32.xlu0 %v9_v1, %s65_s0 }
   0xb   :  { %22 = vrot.lane.b32.xlu1 %v21_v2, %s66_s8  ;;  %v15_v3 = vld [vmem:[#allocation0] sm:$0x1]  }
   0xc   :  { %v27_v4 = vld [vmem:[#allocation0] sm:$0x1]  }
   0xd   :  { %v6_v5 = vld [vmem:[#allocation0] sm:$0x1]  }
   0xe   :  { %8 = vst.msk [vmem:[%s118_s1] sm:$0x1] %vm7_vm0, %v6_v5   ;;  %16 = vrot.lane.b32.xlu0 %v15_v3, %s67_s11  ;;  %v33_v6 = vld [vmem:[#allocation0] sm:$0x1]  }
   0xf   :  { %28 = vrot.lane.b32.xlu1 %v27_v4, %s68_s12  ;;  %v39_v7 = vld [vmem:[#allocation0] sm:$0x1]  }
  0x10   :  { %v45_v8 = vld [vmem:[#allocation0] sm:$0x1]  }
  0x12   :  { %34 = vrot.lane.b32.xlu0 %v33_v6, %s69_s13 }
  0x13   :  { %40 = vrot.lane.b32.xlu1 %v39_v7, %s70_s14 }
  0x16   :  { %46 = vrot.lane.b32.xlu0 %v45_v8, %s71_s15 }
  0x7c   :  { %v11_v9 = vpop.permute.xlu0 %10  }
  0x7d   :  { %v23_v10 = vpop.permute.xlu1 %22   ;;  %51 = vst.msk [vmem:[%s118_s1 + $0x1] sm:$0x1] %vm7_vm0, %v11_v9  }
  0x7e   :  { %53 = vst.msk [vmem:[%s118_s1 + $0x3] sm:$0x1] %vm7_vm0, %v23_v10  }
  0x80   :  { %v17_v11 = vpop.permute.xlu0 %16  }
  0x81   :  { %v29_v12 = vpop.permute.xlu1 %28   ;;  %52 = vst.msk [vmem:[%s118_s1 + $0x2] sm:$0x1] %vm7_vm0, %v17_v11  }
  0x82   :  { %54 = vst.msk [vmem:[%s118_s1 + $0x4] sm:$0x1] %vm7_vm0, %v29_v12  }
  0x84   :  { %v35_v13 = vpop.permute.xlu0 %34  }
  0x85   :  { %v41_v14 = vpop.permute.xlu1 %40   ;;  %55 = vst.msk [vmem:[%s118_s1 + $0x5] sm:$0x1] %vm7_vm0, %v35_v13  }
  0x86   :  { %56 = vst.msk [vmem:[%s118_s1 + $0x6] sm:$0x1] %vm7_vm0, %v41_v14  }
  0x88   :  { %v47_v15 = vpop.permute.xlu0 %46  }
  0x89   :  { %57 = vst.msk [vmem:[%s118_s1 + $0x7] sm:$0x1] %vm7_vm0, %v47_v15  }

// kernel: monet_forward.8
= control target key start
LH: loop header
LB: loop body
LE: loop exit
PB: predicated region body
PF: predicated region fallthrough
CT: control target
= control target key end

     0   :  { %v141_v0 = vmov 0.0|0.0   ;;  %vm142_vm0 = vmmov 0   ;;  %v143_v4 = vmov 0.0   ;;  %vm28_vm1 = vcmask 261120   ;;  %s193_s1 = inlined_call_operand.vmem [shape: f32[32,20], index: 1, kind: input, shape index: {}]   ;;  %s194_s0 = inlined_call_operand.vmem [shape: f32[8,32], index: 0, kind: input, shape index: {}]   ;;  %s195_s2 = inlined_call_operand.vmem [shape: f32[1,20], index: 2, kind: input, shape index: {}]   ;;  %s196_s3 = inlined_call_operand.vmem [shape: f32[8,20], index: 3, kind: output, shape index: {0}]   ;;  %s197_s4 = inlined_call_operand.vmem [shape: f32[8,20], index: 4, kind: output, shape index: {1}]  }
   0x1   :  { %132 = vmatprep.subr.bf16.mxu0 %v141_v0  ;;  %v17_v1 = vld [vmem:[%s193_s1] sm:$0xff]  ;;  %v18_v2 = vld [vmem:[%s193_s1 + $0x8] sm:$0xff]  ;;  %v19_v3 = vld [vmem:[%s193_s1 + $0x10] sm:$0xff]  ;;  %129 = vmatprep.mubr.msk.f32.mxu0 %vm142_vm0, %v143_v4  ;;  %vm102_vm2 = vcmask 162816  }
   0x2   :  { %v133_v5 = vpack.c.bf16 %v18_v2, %v17_v1  ;;  %v20_v6 = vld [vmem:[%s193_s1 + $0x18] sm:$0xff]  ;;  %v16_v8 = vld [vmem:[%s194_s0] sm:$0xff] }
   0x3   :  { %v136_v7 = vpack.c.bf16 %v20_v6, %v19_v3  ;;  %v114_v9 = vld [vmem:[%s195_s2] ss:$0 sm:$0xff] }
   0x4   :  { %134 = vmatpush3.bf16.msra.mxu0 %v133_v5 }
   0x5   :  { %135 = vmatprep.subr.bf16.mxu0 %v141_v0 }
   0x8   :  { %137 = vmatpush3.bf16.msra.mxu0 %v136_v7 }
   0xb   :  { %130 = vmatmul.mubr.msk.f32.vlgmr.msra.gmra.mrb[0].mxu0 %vm28_vm1, %v16_v8 }
  0xde   :  { %v98_v10 = vpop.f32.mrb[0].mxu0 }
  0xdf   :  { %v99_v11 = vadd.f32 %v114_v9, %v98_v10  ;;  %v131_v12 = vpop.f32.mrb[1].mxu0 }
  0xe1   :  { %103 = vst.msk [vmem:[%s196_s3] sm:$0xff] %vm102_vm2, %v99_v11  ;;  %v104_v13 = vmul.f32 %v99_v11, %v99_v11 }
  0xe3   :  { %105 = vst.msk [vmem:[%s197_s4] sm:$0xff] %vm102_vm2, %v104_v13 }

// kernel: monet_forward.9
= control target key start
LH: loop header
LB: loop body
LE: loop exit
PB: predicated region body
PF: predicated region fallthrough
CT: control target
= control target key end

     0   :  { %s747_s21 = smov 0   ;;  %s793_s0 = inlined_call_operand.vmem [shape: f32[8,20], index: 0, kind: input, shape index: {}]   ;;  %s794_s1 = inlined_call_operand.vmem [shape: f32[8,20], index: 1, kind: input, shape index: {}]   ;;  %s795_s2 = inlined_call_operand.vmem [shape: f32[5,20,16], index: 2, kind: input, shape index: {}]   ;;  %s796_s3 = inlined_call_operand.vmem [shape: f32[5,20,16], index: 3, kind: input, shape index: {}]   ;;  %s797_s4 = inlined_call_operand.vmem [shape: f32[5,1,16], index: 4, kind: input, shape index: {}]   ;;  %s798_s5 = inlined_call_operand.vmem [shape: f32[16,4], index: 5, kind: input, shape index: {}]   ;;  %s799_s6 = inlined_call_operand.vmem [shape: f32[5,8,4], index: 6, kind: output, shape index: {}]  }
   0x1 LB: > { %s622_s22 = sadd.s32 4294967295, %s707_s21   ;;  %p626_p0 = scmp.ge.s32.totalorder %s707_s21, 1  ;;  %s707_s21 = sphi %s747_s21, %s16_s21  }
   0x2   : > { %p230_p1 = scmp.lt.s32.totalorder %s707_s21, 6 }
   0x4   : > { %p231_p2 = pnand %p626_p0, %p230_p1 }
   0x5   : > { %p267_p3 = scmp.lt.s32.totalorder (!%p231_p2), %s622_s22, 4  ;;  %v709_v0 = vmov (!%p231_p2), 0.0|0.0   ;;  %vm710_vm0 = vmmov (!%p231_p2), 0   ;;  %v711_v1 = vmov (!%p231_p2), 0.0   ;;  %vm292_vm1 = vcmask (!%p231_p2), 1043456   ;;  %v366_v10 = vld [vmem:[%s793_s0] sm:$0xff] (!%p231_p2) }
   0x6   : > { %234 = sbr.rel (%p231_p2) target bundleno = 785 (0x311), region = 44  ;;  %677 = vmatprep.subr.bf16.mxu1 (!%p231_p2), %v709_v0  ;;  %674 = vmatprep.subr.bf16.mxu0 (!%p231_p2), %v709_v0  ;;  %vm288_vm2 = vcmask (!%p231_p2), 162816   ;;  %v284_v11 = vld [vmem:[%s794_s1] sm:$0xff] (!%p231_p2)  ;;  %v460_v13 = vld [vmem:[%s798_s5 + $0x8] sm:$0xff] (!%p231_p2)  ;;  %vm461_vm3 = vcmask (!%p231_p2), 130048   ;;  %vm535_vm4 = vcmask (!%p231_p2), 31744  }
   0x7   : > { %664 = vmatprep.mubr.msk.f32.mxu1 (!%p231_p2), %vm710_vm0, %v711_v1  ;;  %655 = vmatprep.mubr.msk.f32.mxu0 (!%p231_p2), %vm710_vm0, %v711_v1  ;;  %v459_v12 = vld [vmem:[%s798_s5] sm:$0xff] (!%p231_p2) }
   0x8   : > { %v681_v14 = vpack.c.bf16 (!%p231_p2), %v460_v13, %v459_v12 }
   0xd   : > { %s801_s22 = smov (!%p267_p3, %s622_s22), 4 }
   0xe   : > { %s683_s23 = smul.u32 24, %s801_s22  ;;  %s279_s16 = scalar_lea.vmem %s797_s4, %s801_s22 }
   0xf   : > { %v634_v19 = vld [vmem:[%s279_s16] ss:$0 sm:$0xff]  ;;  %s629_s17 = sshll.u32 %s801_s22, 3 }
  0x10   : > { %s276_s26 = scalar_lea.vmem %s796_s3, %s683_s23  ;;  %s271_s29 = scalar_lea.vmem %s795_s2, %s683_s23 }
  0x11   : > { %v367_v2 = vld [vmem:[%s276_s26] sm:$0xff]  ;;  %v368_v3 = vld [vmem:[%s276_s26 + $0x8] sm:$0xff]  ;;  %v369_v8 = vld [vmem:[%s276_s26 + $0x10] sm:$0xf]  ;;  %s283_s20 = scalar_lea.vmem %s799_s6, %s629_s17 }
  0x12   : > { %v285_v4 = vld [vmem:[%s271_s29] sm:$0xff]  ;;  %v678_v5 = vpack.c.bf16 %v368_v3, %v367_v2  ;;  %v286_v6 = vld [vmem:[%s271_s29 + $0x8] sm:$0xff]  ;;  %v287_v9 = vld [vmem:[%s271_s29 + $0x10] sm:$0xf] }
  0x13   : > { %v675_v7 = vpack.c.bf16 %v286_v6, %v285_v4 }
  0x14   : > { %679 = vmatpush3.bf16.msra.mxu1 %v678_v5 }
  0x15   : > { %676 = vmatpush3.bf16.msra.mxu0 %v675_v7  ;;  %662 = vmatprep.subr.mxu1 %v711_v1 }
  0x16   : > { %653 = vmatprep.subr.mxu0 %v711_v1 }
  0x18   : > { %663 = vmatpush3.msk.msra.mxu1 %vm292_vm1, %v369_v8 }
  0x19   : > { %654 = vmatpush3.msk.msra.mxu0 %vm292_vm1, %v287_v9  ;;  %665 = vmatmul.mubr.msk.f32.vlgmr.msra.gmra.mrb[0].mxu1 %vm288_vm2, %v366_v10 }
  0x1a   : > { %656 = vmatmul.mubr.msk.f32.vlgmr.msra.gmra.mrb[0].mxu0 %vm288_vm2, %v284_v11  ;;  %680 = vmatprep.subr.bf16.mxu0 %v709_v0 }
  0x1b   : > { %671 = vmatprep.mubr.msk.f32.mxu0 %vm710_vm0, %v711_v1  ;;  %682 = vmatpush3.bf16.msra.mxu0 %v681_v14 }
  0xec   : > { %v442_v15 = vpop.f32.mrb[0].mxu1 }
  0xed   : > { %v446_v16 = vmul.f32 2.0, %v442_v15  ;;  %v362_v17 = vpop.f32.mrb[0].mxu0  ;;  %v666_v18 = vpop.f32.mrb[1].mxu1 }
  0xee   : > { %v657_v20 = vpop.f32.mrb[1].mxu0 }
  0xef   : > { %v447_v21 = vsub.f32 %v362_v17, %v446_v16 }
  0xf1   : > { %v455_v22 = vadd.f32 %v634_v19, %v447_v21 }
  0xf3   : > { %v456_v23 = vmul.f32 -0.5, %v455_v22 }
  0xf5   : > { %v457_v24 = vmul.f32 1.442695, %v456_v23 }
  0xf7   : > { %695 = vpow2.f32 %v457_v24 }
 0x101   : > { %v696_v25 = vpop.eup %695 }
 0x102   : > { %672 = vmatmul.mubr.msk.f32.vlgmr.msra.gmra.mrb[2].mxu0 %vm461_vm3, %v696_v25 }
 0x1d5   : > { %v531_v26 = vpop.f32.mrb[2].mxu0 }
 0x1d6   : > { %v673_v27 = vpop.f32.mrb[3].mxu0  ;;  %v536_v28 = vsel %vm535_vm4, %v531_v26, -inf }
 0x1d7   : > { %537 = vmax.xlane.f32.xlu0 %v536_v28 }
 0x264   : > { %v538_v29 = vpop.xlane.xlu0 %537 }
 0x265   : > { %v539_v30 = vsub.f32 %v531_v26, %v538_v29 }
 0x267   : > { %v540_v31 = vmul.f32 1.442695, %v539_v30 }
 0x269   : > { %697 = vpow2.f32 %v540_v31 }
 0x273   : > { %v698_v32 = vpop.eup %697 }
 0x274   : > { %v542_v33 = vsel %vm535_vm4, %v698_v32, 0.0 }
 0x275   : > { %543 = vadd.xlane.f32.xlu0 %v542_v33 }
 0x302   : > { %v544_v34 = vpop.xlane.xlu0 %543 }
 0x303   : > { %699 = vrcp.f32 %v544_v34 }
 0x30d   : > { %v700_v35 = vpop.eup %699 }
 0x30e   : > { %v546_v36 = vmul.f32 %v700_v35, %v698_v32 }
 0x310   : > { %547 = vst.msk [vmem:[%s283_s20] sm:$0xff] %vm535_vm4, %v546_v36 }
 0x311 PF: > { %s16_s21 = sadd.s32 1, %s707_s21  }
 0x312   : > { %p13_p4 = scmp.ge.s32.totalorder %s16_s21, 7  }
 0x314   :  { %15 = sbr.rel (!%p13_p4) target bundleno = 1 (0x1), region = 80 }

// kernel: monet_forward.10
= control target key start
LH: loop header
LB: loop body
LE: loop exit
PB: predicated region body
PF: predicated region fallthrough
CT: control target
= control target key end

     0   :  { %s821_s29 = smov 0   ;;  %s870_s0 = inlined_call_operand.vmem [shape: f32[8,8], index: 0, kind: input, shape index: {}]   ;;  %s871_s1 = inlined_call_operand.vmem [shape: f32[2,8,16], index: 1, kind: input, shape index: {}]   ;;  %s872_s2 = inlined_call_operand.vmem [shape: f32[1,16], index: 2, kind: input, shape index: {}]   ;;  %s873_s3 = inlined_call_operand.vmem [shape: f32[1,16], index: 3, kind: input, shape index: {}]   ;;  %s874_s4 = inlined_call_operand.vmem [shape: f32[16,32], index: 4, kind: input, shape index: {}]   ;;  %s875_s5 = inlined_call_operand.vmem [shape: f32[16,32], index: 5, kind: input, shape index: {}]   ;;  %s876_s6 = inlined_call_operand.vmem [shape: f32[1,32], index: 6, kind: input, shape index: {}]   ;;  %s877_s7 = inlined_call_operand.vmem [shape: f32[2,8,32], index: 7, kind: output, shape index: {0}]   ;;  %s878_s8 = inlined_call_operand.vmem [shape: f32[2,1,32], index: 8, kind: output, shape index: {1}]   ;;  %s879_s9 = inlined_call_operand.vmem [shape: f32[2,1,32], index: 9, kind: output, shape index: {2}]  }
   0x1 LB: > { %s703_s3 = sadd.s32 4294967295, %s766_s29   ;;  %p707_p0 = scmp.ge.s32.totalorder %s766_s29, 1  ;;  %s766_s29 = sphi %s821_s29, %s20_s29  }
   0x2   : > { %p291_p1 = scmp.lt.s32.totalorder %s766_s29, 3 }
   0x4   : > { %p292_p2 = pnand %p707_p0, %p291_p1 }
   0x5   : > { %p331_p3 = scmp.lt.s32.totalorder (!%p292_p2), %s703_s3, 1  ;;  %v768_v0 = vmov (!%p292_p2), 0.0   ;;  %vm769_vm0 = vmmov (!%p292_p2), 0   ;;  %v423_v1 = vld [vmem:[%s875_s5] sm:$0xff] (!%p292_p2)  ;;  %v424_v2 = vld [vmem:[%s875_s5 + $0x8] sm:$0xff] (!%p292_p2)  ;;  %v770_v3 = vmov (!%p292_p2), 0.0|0.0  }
   0x6   : > { %295 = sbr.rel (%p292_p2) target bundleno = 462 (0x1ce), region = 48  ;;  %724 = vmatprep.subr.mxu0 (!%p292_p2), %v768_v0  ;;  %726 = vmatprep.mubr.msk.f32.mxu0 (!%p292_p2), %vm769_vm0, %v768_v0  ;;  %v744_v4 = vpack.c.bf16 (!%p292_p2), %v424_v2, %v423_v1  ;;  %v421_v5 = vld [vmem:[%s874_s4] sm:$0xff] (!%p292_p2)  ;;  %v422_v6 = vld [vmem:[%s874_s4 + $0x8] sm:$0xff] (!%p292_p2)  ;;  %vm347_vm1 = vcmask (!%p292_p2), 64512   ;;  %vm425_vm2 = vcmask (!%p292_p2), 130048   ;;  %vm580_vm3 = vcmask (!%p292_p2), 261120  }
   0x7   : > { %743 = vmatprep.subr.bf16.mxu1 (!%p292_p2), %v770_v3  ;;  %733 = vmatprep.mubr.msk.f32.mxu1 (!%p292_p2), %vm769_vm0, %v768_v0  ;;  %v346_v7 = vld [vmem:[%s870_s0] sm:$0xff] (!%p292_p2)  ;;  %v747_v8 = vpack.c.bf16 (!%p292_p2), %v422_v6, %v421_v5  ;;  %vm589_vm4 = vcmask (!%p292_p2), 253952  }
   0x8   : > { %745 = vmatpush3.bf16.msra.mxu1 (!%p292_p2), %v744_v4  ;;  %v713_v15 = vld [vmem:[%s876_s6] ss:$0 sm:$0xff] (!%p292_p2) }
   0xd   : > { %s881_s3 = smov (!%p331_p3, %s703_s3), 1 }
   0xe   : > { %s708_s17 = sshll.u32 %s881_s3, 3  ;;  %s341_s30 = scalar_lea.vmem %s878_s8, %s881_s3 }
   0xf   : > { %s334_s20 = scalar_lea.vmem %s871_s1, %s708_s17  ;;  %s338_s27 = scalar_lea.vmem %s877_s7, %s708_s17 }
  0x10   : > { %v345_v9 = vld [vmem:[%s334_s20] sm:$0xff]  ;;  %s344_s12 = scalar_lea.vmem %s879_s9, %s881_s3 }
  0x11   : > { %725 = vmatpush3.msra.mxu0 %v345_v9  ;;  %734 = vmatmul.mubr.msk.f32.vlgmr.msra.gmra.mrb[0].mxu1 %vm425_vm2, %v345_v9 }
  0x12   : > { %727 = vmatmul.mubr.msk.f32.vlgmr.msra.gmra.mrb[0].mxu0 %vm347_vm1, %v346_v7  ;;  %746 = vmatprep.subr.bf16.mxu0 %v770_v3 }
  0x13   : > { %748 = vmatpush3.bf16.msra.mxu0 %v747_v8  ;;  %740 = vmatprep.mubr.msk.f32.mxu0 %vm769_vm0, %v768_v0 }
  0xe4   : > { %v495_v12 = vpop.f32.mrb[0].mxu1 }
  0xe5   : > { %v417_v10 = vpop.f32.mrb[0].mxu0  ;;  %v735_v13 = vpop.f32.mrb[1].mxu1 }
  0xe6   : > { %v728_v11 = vpop.f32.mrb[1].mxu0  ;;  %741 = vmatmul.mubr.msk.f32.vlgmr.msra.gmra.mrb[2].mxu0 %vm425_vm2, %v417_v10 }
 0x1b9   : > { %v568_v14 = vpop.f32.mrb[2].mxu0 }
 0x1ba   : > { %v569_v16 = vadd.f32 %v568_v14, %v495_v12  ;;  %v742_v17 = vpop.f32.mrb[3].mxu0 }
 0x1bc   : > { %v579_v18 = vadd.f32 %v713_v15, %v569_v16 }
 0x1be   : > { %581 = vst.msk [vmem:[%s338_s27] sm:$0xff] %vm580_vm3, %v579_v18  ;;  %v582_v19 = vsel %vm580_vm3, %v579_v18, 0.0  ;;  %v591_v20 = vmul.f32 %v579_v18, %v579_v18 }
 0x1bf   : > { %v583_v21 = vrot.slane %v582_v19, 4 }
 0x1c0   : > { %v592_v22 = vsel %vm580_vm3, %v591_v20, 0.0 }
 0x1c1   : > { %v584_v23 = vadd.f32 %v583_v21, %v582_v19  ;;  %v593_v24 = vrot.slane %v592_v22, 4 }
 0x1c3   : > { %v585_v25 = vrot.slane %v584_v23, 2  ;;  %v594_v26 = vadd.f32 %v593_v24, %v592_v22 }
 0x1c5   : > { %v586_v27 = vadd.f32 %v585_v25, %v584_v23  ;;  %v595_v28 = vrot.slane %v594_v26, 2 }
 0x1c7   : > { %v587_v29 = vrot.slane %v586_v27, 1  ;;  %v596_v30 = vadd.f32 %v595_v28, %v594_v26 }
 0x1c9   : > { %v588_v31 = vadd.f32 %v587_v29, %v586_v27  ;;  %v597_v32 = vrot.slane %v596_v30, 1 }
 0x1cb   : > { %590 = vst.msk [vmem:[%s341_s30] sm:$0x1] %vm589_vm4, %v588_v31  ;;  %v598_v33 = vadd.f32 %v597_v32, %v596_v30 }
 0x1cd   : > { %599 = vst.msk [vmem:[%s344_s12] sm:$0x1] %vm589_vm4, %v598_v33 }
 0x1ce PF: > { %s20_s29 = sadd.s32 1, %s766_s29  }
 0x1cf   : > { %p17_p4 = scmp.ge.s32.totalorder %s20_s29, 4  }
 0x1d1   :  { %19 = sbr.rel (!%p17_p4) target bundleno = 1 (0x1), region = 102 }

// kernel: monet_forward.11
= control target key start
LH: loop header
LB: loop body
LE: loop exit
PB: predicated region body
PF: predicated region fallthrough
CT: control target
= control target key end

     0   :  { %s861_s30 = smov 0   ;;  %s937_s0 = inlined_call_operand.vmem [shape: f32[8,8], index: 0, kind: input, shape index: {}]   ;;  %s938_s1 = inlined_call_operand.vmem [shape: f32[2,8,32], index: 1, kind: input, shape index: {}]   ;;  %s939_s2 = inlined_call_operand.vmem [shape: f32[1,32], index: 2, kind: input, shape index: {}]   ;;  %s940_s3 = inlined_call_operand.vmem [shape: f32[1,32], index: 3, kind: input, shape index: {}]   ;;  %s941_s4 = inlined_call_operand.vmem [shape: f32[32,32], index: 4, kind: input, shape index: {}]   ;;  %s942_s5 = inlined_call_operand.vmem [shape: f32[32,32], index: 5, kind: input, shape index: {}]   ;;  %s943_s6 = inlined_call_operand.vmem [shape: f32[1,32], index: 6, kind: input, shape index: {}]   ;;  %s944_s7 = inlined_call_operand.vmem [shape: f32[2,8,32], index: 7, kind: output, shape index: {0}]   ;;  %s945_s8 = inlined_call_operand.vmem [shape: f32[2,1,32], index: 8, kind: output, shape index: {1}]   ;;  %s946_s9 = inlined_call_operand.vmem [shape: f32[2,1,32], index: 9, kind: output, shape index: {2}]  }
   0x1 LB: > { %s723_s10 = sadd.s32 4294967295, %s806_s30   ;;  %p727_p0 = scmp.ge.s32.totalorder %s806_s30, 1  ;;  %s806_s30 = sphi %s861_s30, %s20_s30  }
   0x2   : > { %p291_p1 = scmp.lt.s32.totalorder %s806_s30, 3 }
   0x4   : > { %p292_p2 = pnand %p727_p0, %p291_p1 }
   0x5   : > { %p331_p3 = scmp.lt.s32.totalorder (!%p292_p2), %s723_s10, 1  ;;  %v808_v0 = vmov (!%p292_p2), 0.0   ;;  %v442_v1 = vld [vmem:[%s942_s5] sm:$0xff] (!%p292_p2)  ;;  %v443_v2 = vld [vmem:[%s942_s5 + $0x8] sm:$0xff] (!%p292_p2)  ;;  %vm809_vm0 = vmmov (!%p292_p2), 0   ;;  %v810_v3 = vmov (!%p292_p2), 0.0|0.0  }
   0x6   : > { %295 = sbr.rel (%p292_p2) target bundleno = 468 (0x1d4), region = 48  ;;  %750 = vmatprep.subr.mxu0 (!%p292_p2), %v808_v0  ;;  %752 = vmatprep.mubr.msk.f32.mxu0 (!%p292_p2), %vm809_vm0, %v808_v0  ;;  %v778_v4 = vpack.c.bf16 (!%p292_p2), %v443_v2, %v442_v1  ;;  %v444_v5 = vld [vmem:[%s942_s5 + $0x10] sm:$0xff] (!%p292_p2)  ;;  %v445_v6 = vld [vmem:[%s942_s5 + $0x18] sm:$0xff] (!%p292_p2)  ;;  %v730_v7 = vld [vmem:[%s939_s2] ss:$0 sm:$0xff] (!%p292_p2)  ;;  %vm364_vm1 = vcmask (!%p292_p2), 64512  }
   0x7   : > { %777 = vmatprep.subr.bf16.mxu1 (!%p292_p2), %v810_v3  ;;  %763 = vmatprep.mubr.msk.f32.mxu1 (!%p292_p2), %vm809_vm0, %v808_v0  ;;  %v781_v8 = vpack.c.bf16 (!%p292_p2), %v445_v6, %v444_v5  ;;  %v731_v10 = vld [vmem:[%s940_s3] ss:$0 sm:$0xff] (!%p292_p2)  ;;  %v439_v13 = vld [vmem:[%s941_s4 + $0x8] sm:$0xff] (!%p292_p2)  ;;  %v440_v18 = vld [vmem:[%s941_s4 + $0x10] sm:$0xff] (!%p292_p2)  ;;  %vm446_vm2 = vcmask (!%p292_p2), 261120   ;;  %vm609_vm3 = vcmask (!%p292_p2), 253952  }
   0x8   : > { %779 = vmatpush3.bf16.msra.mxu1 (!%p292_p2), %v778_v4  ;;  %v438_v12 = vld [vmem:[%s941_s4] sm:$0xff] (!%p292_p2)  ;;  %v441_v19 = vld [vmem:[%s941_s4 + $0x18] sm:$0xff] (!%p292_p2) }
   0x9   : > { %780 = vmatprep.subr.bf16.mxu1 (!%p292_p2), %v810_v3  ;;  %v363_v16 = vld [vmem:[%s937_s0] sm:$0xff] (!%p292_p2)  ;;  %v784_v17 = vpack.c.bf16 (!%p292_p2), %v439_v13, %v438_v12  ;;  %v787_v20 = vpack.c.bf16 (!%p292_p2), %v441_v19, %v440_v18 }
   0xa   : > { %v735_v26 = vld [vmem:[%s943_s6] ss:$0 sm:$0xff] (!%p292_p2) }
   0xc   : > { %782 = vmatpush3.bf16.msra.mxu1 (!%p292_p2), %v781_v8 }
   0xd   : > { %s948_s10 = smov (!%p331_p3, %s723_s10), 1 }
   0xe   : > { %s728_s19 = sshll.u32 %s948_s10, 3  ;;  %s341_s25 = scalar_lea.vmem %s945_s8, %s948_s10 }
   0xf   : > { %s334_s24 = scalar_lea.vmem %s938_s1, %s728_s19  ;;  %s338_s23 = scalar_lea.vmem %s944_s7, %s728_s19 }
  0x10   : > { %v345_v9 = vld [vmem:[%s334_s24] sm:$0xff]  ;;  %s344_s28 = scalar_lea.vmem %s946_s9, %s948_s10 }
  0x11   : > { %v353_v11 = vmul.f32 %v730_v7, %v345_v9 }
  0x13   : > { %v361_v14 = vadd.f32 %v731_v10, %v353_v11 }
  0x15   : > { %v362_v15 = vmax.f32 %v361_v14, 0.0 }
  0x17   : > { %751 = vmatpush3.msra.mxu0 %v362_v15  ;;  %764 = vmatmul.mubr.msk.f32.vlgmr.msra.gmra.mrb[0].mxu1 %vm446_vm2, %v362_v15 }
  0x18   : > { %753 = vmatmul.mubr.msk.f32.vlgmr.msra.gmra.mrb[0].mxu0 %vm364_vm1, %v363_v16  ;;  %783 = vmatprep.subr.bf16.mxu0 %v810_v3 }
  0x19   : > { %785 = vmatpush3.bf16.msra.mxu0 %v784_v17  ;;  %774 = vmatprep.mubr.msk.f32.mxu0 %vm809_vm0, %v808_v0 }
  0x1a   : > { %786 = vmatprep.subr.bf16.mxu0 %v810_v3 }
  0x1d   : > { %788 = vmatpush3.bf16.msra.mxu0 %v787_v20 }
  0xea   : > { %v516_v23 = vpop.f32.mrb[0].mxu1 }
  0xeb   : > { %v434_v21 = vpop.f32.mrb[0].mxu0  ;;  %v765_v24 = vpop.f32.mrb[1].mxu1 }
  0xec   : > { %v754_v22 = vpop.f32.mrb[1].mxu0  ;;  %775 = vmatmul.mubr.msk.f32.vlgmr.msra.gmra.mrb[2].mxu0 %vm446_vm2, %v434_v21 }
 0x1bf   : > { %v589_v25 = vpop.f32.mrb[2].mxu0 }
 0x1c0   : > { %v590_v27 = vadd.f32 %v589_v25, %v516_v23  ;;  %v776_v28 = vpop.f32.mrb[3].mxu0 }
 0x1c2   : > { %v600_v29 = vadd.f32 %v735_v26, %v590_v27 }
 0x1c4   : > { %601 = vst.msk [vmem:[%s338_s23] sm:$0xff] %vm446_vm2, %v600_v29  ;;  %v602_v30 = vsel %vm446_vm2, %v600_v29, 0.0  ;;  %v611_v31 = vmul.f32 %v600_v29, %v600_v29 }
 0x1c5   : > { %v603_v32 = vrot.slane %v602_v30, 4 }
 0x1c6   : > { %v612_v33 = vsel %vm446_vm2, %v611_v31, 0.0 }
 0x1c7   : > { %v604_v34 = vadd.f32 %v603_v32, %v602_v30  ;;  %v613_v35 = vrot.slane %v612_v33, 4 }
 0x1c9   : > { %v605_v36 = vrot.slane %v604_v34, 2  ;;  %v614_v37 = vadd.f32 %v613_v35, %v612_v33 }
 0x1cb   : > { %v606_v38 = vadd.f32 %v605_v36, %v604_v34  ;;  %v615_v39 = vrot.slane %v614_v37, 2 }
 0x1cd   : > { %v607_v40 = vrot.slane %v606_v38, 1  ;;  %v616_v41 = vadd.f32 %v615_v39, %v614_v37 }
 0x1cf   : > { %v608_v42 = vadd.f32 %v607_v40, %v606_v38  ;;  %v617_v43 = vrot.slane %v616_v41, 1 }
 0x1d1   : > { %610 = vst.msk [vmem:[%s341_s25] sm:$0x1] %vm609_vm3, %v608_v42  ;;  %v618_v44 = vadd.f32 %v617_v43, %v616_v41 }
 0x1d3   : > { %619 = vst.msk [vmem:[%s344_s28] sm:$0x1] %vm609_vm3, %v618_v44 }
 0x1d4 PF: > { %s20_s30 = sadd.s32 1, %s806_s30  }
 0x1d5   : > { %p17_p4 = scmp.ge.s32.totalorder %s20_s30, 4  }
 0x1d7   :  { %19 = sbr.rel (!%p17_p4) target bundleno = 1 (0x1), region = 102 }

// kernel: monet_forward.15
= control target key start
LH: loop header
LB: loop body
LE: loop exit
PB: predicated region body
PF: predicated region fallthrough
CT: control target
= control target key end

     0   :  { %12 = vsyncpa [#allocation4], 0  ;;  %s836_s24 = smov 0   ;;  %s939_s0 = inlined_call_operand.vmem [shape: f32[2,256], index: 0, kind: input, shape index: {}]   ;;  %s940_s1 = inlined_call_operand.vmem [shape: f32[1,256], index: 1, kind: input, shape index: {}]   ;;  %s941_s2 = inlined_call_operand.vmem [shape: f32[1,256], index: 2, kind: input, shape index: {}]   ;;  %s942_s3 = inlined_call_operand.vmem [shape: bf16[256,64], index: 3, kind: input, shape index: {}]   ;;  %s943_s4 = inlined_call_operand.vmem [shape: f32[1,64], index: 4, kind: input, shape index: {}]   ;;  %s944_s5 = inlined_call_operand.vmem [shape: f32[64,20], index: 5, kind: input, shape index: {}]   ;;  %s945_s6 = inlined_call_operand.vmem [shape: f32[1,20], index: 6, kind: input, shape index: {}]   ;;  %s946_s7 = inlined_call_operand.hbm [shape: f32[2,20], index: 7, kind: output, shape index: {}]  }
   0x1 LB: > { %s842_s25 = sadd.s32 4294967295, %s787_s24   ;;  %p630_p0 = scmp.ge.s32.totalorder %s787_s24, 1  ;;  %s787_s24 = sphi %s836_s24, %s18_s24  }
   0x2   : > { %p259_p1 = scmp.lt.s32.totalorder %s787_s24, 3 }
   0x4   : > { %p260_p2 = pnand %p630_p0, %p259_p1 }
   0x5   : > { %p296_p3 = scmp.lt.s32.totalorder (!%p260_p2), %s842_s25, 1  ;;  %s632_s26 = sshll.u32 (!%p260_p2), %s842_s25, 4 }
   0x6   : > { %263 = sbr.rel (%p260_p2) target bundleno = 520 (0x208), region = 48  ;;  %p307_p4 = scmp.lt.s32.totalorder (!%p260_p2), %s632_s26, 31 }
   0x7   : > { %p634_p5 = scmp.ne.s32.totalorder (!%p260_p2), %s842_s25, 0 }
   0xd   : > { %s849_s27 = scalar_select %p296_p3, %s842_s25, 1 }
   0xe   : > { %s948_s26 = smov (!%p307_p4, %s632_s26), 31  ;;  %316 = sbr.rel (%p634_p5) target bundleno = 21 (0x15), region = 52 }
   0xf   : > { %s631_s28 = sshll.u32 %s849_s27, 1  ;;  %s302_s8 = scalar_lea.vmem %s940_s1, %s849_s27  ;;  %vm317_vm0 = vcmask (!%p634_p5), 517120   ;;  %v789_v0 = vmov (!%p634_p5), 0.0  }
  0x10   : > { %s299_s11 = scalar_lea.vmem %s939_s0, %s631_s28  ;;  %s305_s14 = scalar_lea.vmem %s941_s2, %s849_s27  ;;  %318 = vst.msk [vmem:[#allocation2] sm:$0x3] (!%p634_p5), %vm317_vm0, %v789_v0 }
  0x11   : > { %s633_s15 = sshll.u32 %s948_s26, 2 }
  0x12   : > { %s866_s18 = scalar_lea.vmem %s942_s3, %s633_s15 }
  0x15 PF: > { %v743_v1 = vld [vmem:[%s866_s18] sm:$0xff]   ;;  %v790_v2 = vmov 0.0   ;;  %v744_v3 = vld [vmem:[%s866_s18 + $0x8] sm:$0xff]   ;;  %vm791_vm1 = vmmov 0   ;;  %v745_v4 = vld [vmem:[%s866_s18 + $0x10] sm:$0xff]   ;;  %vm444_vm2 = vcmask 517120  }
  0x16   : > { %671 = vmatprep.subr.bf16.mxu0 %v790_v2  ;;  %687 = vmatprep.mubr.msk.bf16.mxu0 %vm791_vm1, %v790_v2  ;;  %v746_v5 = vld [vmem:[%s866_s18 + $0x18] sm:$0xff]   ;;  %v747_v6 = vld [vmem:[%s866_s18 + $0x20] sm:$0xff]   ;;  %v748_v10 = vld [vmem:[%s866_s18 + $0x28] sm:$0xff]   ;;  %p645_p6 = scmp.ne.s32.totalorder %s842_s25, 1 }
  0x17   : > { %672 = vmatpush3.bf16.msra.mxu0 %v743_v1  ;;  %v319_v7 = vld [vmem:[%s299_s11] sm:$0x3]  ;;  %v749_v13 = vld [vmem:[%s866_s18 + $0x30] sm:$0xff]   ;;  %v750_v15 = vld [vmem:[%s866_s18 + $0x38] sm:$0xff]   ;;  %v792_v26 = vmov (!%p645_p6), 0.0|0.0   ;;  %vm793_vm3 = vmmov (!%p645_p6), 0  }
  0x18   : > { %673 = vmatprep.subr.bf16.mxu0 %v790_v2  ;;  %v635_v8 = vld [vmem:[%s302_s8] ss:$0 sm:$0xff]  ;;  %v461_v24 = vld [vmem:[%s944_s5 + $0x8] sm:$0xff] (!%p645_p6)  ;;  %v462_v25 = vld [vmem:[%s944_s5 + $0x10] sm:$0xff] (!%p645_p6)  ;;  %v794_v29 = vmov (!%p645_p6), 0.0   ;;  %vm475_vm4 = vcmask (!%p645_p6), 523264  }
  0x19   : > { %v327_v9 = vmul.f32 %v635_v8, %v319_v7  ;;  %v636_v11 = vld [vmem:[%s305_s14] ss:$0 sm:$0xff]  ;;  %v463_v28 = vld [vmem:[%s944_s5 + $0x18] sm:$0xff] (!%p645_p6)  ;;  %v465_v32 = vld [vmem:[%s944_s5 + $0x28] sm:$0xff] (!%p645_p6)  ;;  %vm549_vm5 = vcmask (!%p645_p6), 156672  }
  0x1a   : > { %v337_v17 = vld [vmem:[#allocation2] sm:$0x3]  ;;  %v714_v30 = vpack.c.bf16 (!%p645_p6), %v463_v28, %v462_v25  ;;  %v466_v36 = vld [vmem:[%s944_s5 + $0x30] sm:$0xff] (!%p645_p6)  ;;  %v467_v37 = vld [vmem:[%s944_s5 + $0x38] sm:$0xff] (!%p645_p6) }
  0x1b   : > { %674 = vmatpush3.bf16.msra.mxu0 %v744_v3  ;;  %v335_v12 = vadd.f32 %v636_v11, %v327_v9  ;;  %v460_v23 = vld [vmem:[%s944_s5] sm:$0xff] (!%p645_p6)  ;;  %v720_v39 = vpack.c.bf16 (!%p645_p6), %v467_v37, %v466_v36 }
  0x1c   : > { %675 = vmatprep.subr.bf16.mxu0 %v790_v2  ;;  %v711_v27 = vpack.c.bf16 (!%p645_p6), %v461_v24, %v460_v23  ;;  %v464_v31 = vld [vmem:[%s944_s5 + $0x20] sm:$0xff] (!%p645_p6) }
  0x1d   : > { %v336_v14 = vmax.f32 %v335_v12, 0.0  ;;  %v717_v33 = vpack.c.bf16 (!%p645_p6), %v465_v32, %v464_v31  ;;  %v646_v35 = vld [vmem:[%s943_s4] ss:$0 sm:$0xff] (!%p645_p6) }
  0x1e   : > { %v647_v41 = vld [vmem:[%s945_s6] ss:$0 sm:$0xff] (!%p645_p6) }
  0x1f   : > { %676 = vmatpush3.bf16.msra.mxu0 %v745_v4  ;;  %v338_v16 = vpack.c.bf16 %v336_v14, %v336_v14 }
  0x20   : > { %677 = vmatprep.subr.bf16.mxu0 %v790_v2 }
  0x23   : > { %678 = vmatpush3.bf16.msra.mxu0 %v746_v5 }
  0x24   : > { %679 = vmatprep.subr.bf16.mxu0 %v790_v2 }
  0x27   : > { %680 = vmatpush3.bf16.msra.mxu0 %v747_v6 }
  0x28   : > { %681 = vmatprep.subr.bf16.mxu0 %v790_v2 }
  0x2b   : > { %682 = vmatpush3.bf16.msra.mxu0 %v748_v10 }
  0x2c   : > { %683 = vmatprep.subr.bf16.mxu0 %v790_v2 }
  0x2f   : > { %684 = vmatpush3.bf16.msra.mxu0 %v749_v13 }
  0x30   : > { %685 = vmatprep.subr.bf16.mxu0 %v790_v2 }
  0x33   : > { %686 = vmatpush3.bf16.msra.mxu0 %v750_v15 }
  0x34   : > { %710 = vmatprep.subr.bf16.mxu0 (!%p645_p6), %v792_v26 }
  0x36   : > { %688 = vmatmul.mubr.bf16.vlgmr.msra.gmra.mrb[0].mxu0 %v338_v16 }
  0x37   : > { %707 = vmatprep.mubr.msk.f32.mxu0 (!%p645_p6), %vm793_vm3, %v794_v29  ;;  %712 = vmatpush3.bf16.msra.mxu0 (!%p645_p6), %v711_v27 }
  0x38   : > { %713 = vmatprep.subr.bf16.mxu0 (!%p645_p6), %v792_v26 }
  0x3b   : > { %715 = vmatpush3.bf16.msra.mxu0 (!%p645_p6), %v714_v30 }
  0x3c   : > { %716 = vmatprep.subr.bf16.mxu0 (!%p645_p6), %v792_v26 }
  0x3f   : > { %718 = vmatpush3.bf16.msra.mxu0 (!%p645_p6), %v717_v33 }
  0x40   : > { %719 = vmatprep.subr.bf16.mxu0 (!%p645_p6), %v792_v26 }
  0x43   : > { %721 = vmatpush3.bf16.msra.mxu0 (!%p645_p6), %v720_v39 }
 0x106   : > { %449 = sbr.rel (%p645_p6) target bundleno = 495 (0x1ef), region = 56 }
 0x109   : > { %v437_v18 = vpop.f32.mrb[0].mxu0 }
 0x10a   : > { %v443_v19 = vadd.f32 %v437_v18, %v337_v17  ;;  %v689_v20 = vpop.f32.mrb[1].mxu0 }
 0x10b   : > { %v440_v21 = vpop.f32.mrb[2].mxu0 }
 0x10c   : > { %445 = vst.msk [vmem:[#allocation2] sm:$0x3] %vm444_vm2, %v443_v19  ;;  %v690_v22 = vpop.f32.mrb[3].mxu0 }
 0x113   : > { %v450_v34 = vld [vmem:[#allocation2] sm:$0x3] }
 0x114   : > { %v458_v38 = vadd.f32 %v646_v35, %v450_v34 }
 0x116   : > { %v459_v40 = vmax.f32 %v458_v38, 0.0 }
 0x118   : > { %708 = vmatmul.mubr.msk.f32.vlgmr.msra.gmra.mrb[0].mxu0 %vm475_vm4, %v459_v40 }
 0x1eb   : > { %v545_v42 = vpop.f32.mrb[0].mxu0 }
 0x1ec   : > { %v546_v43 = vadd.f32 %v647_v41, %v545_v42  ;;  %v709_v44 = vpop.f32.mrb[1].mxu0 }
 0x1ee   : > { %550 = vst.msk [vmem:[#allocation3] sm:$0x3] %vm549_vm5, %v546_v43 }
 0x1ef PF: > { %p726_p7 = scmp.eq.s32.totalorder %s842_s25, 1  ;;  %s795_s20 = smov [#allocation3]  }
 0x1f0   : > { %s558_s21 = sshll.u32 %s795_s20, 4  ;;  %s559_s21 = int_to_ptr.vmem [resolvable:$true] %s558_s21 }
 0x1f1   : > { %s751_s22 = scalar_lea.vmem %s559_s21, 32  ;;  %p758_p11 = scmp.lt.s32.totalorder %s559_s21, %s559_s21 }
 0x1f2   : > { %p752_p8 = scmp.ne.s32.totalorder %s559_s21, %s751_s22  ;;  %p759_p12 = scmp.lt.s32.totalorder %s751_s22, %s751_s22 }
 0x1f4   : > { %p753_p9 = pnand %p752_p8, %p726_p7  ;;  %p760_p13 = por %p759_p12, %p758_p11 }
 0x1f6   : > { %p754_p10 = pneg %p753_p9 }
 0x1f8   : > { %p761_p0 = pnand %p760_p13, %p754_p10 }
 0x1fa   : > { %764 = shalt.err (!%p761_p0)
}
 0x1fb   : > { %s765_s27 = scalar_lea.hbm %s946_s7, 32 }
 0x1fc   : > { %p766_p1 = scmp.ne.s32.totalorder %s946_s7, %s765_s27  ;;  %p771_p4 = scmp.lt.u32.totalorder %s765_s27, %s946_s7 }
 0x1fe   : > { %p767_p2 = pnand %p766_p1, %p726_p7 }
 0x200   : > { %p768_p3 = pneg %p767_p2 }
 0x202   : > { %p773_p5 = pnand %p771_p4, %p768_p3 }
 0x204   : > { %776 = shalt.err (!%p773_p5)
}
 0x205   : > { %723 = dma.vmem_to_hbm [thread:$0]  (%p726_p7), %s559_s21, 32, %s946_s7, [#allocation4]  }
 0x206   : > { %782 = dma.done.wait (%p726_p7), [#allocation4], 32  }
 0x207   : > { %784 = vsyncadd (%p726_p7), [#allocation4], 4294967264 }
 0x208 PF: > { %s18_s24 = sadd.s32 1, %s787_s24  }
 0x209   : > { %p15_p6 = scmp.ge.s32.totalorder %s18_s24, 4  }
 0x20b   :  { %17 = sbr.rel (!%p15_p6) target bundleno = 1 (0x1), region = 92 }
 0x212   :  { %571 = vsyncpa [#allocation4], 1 }
 0x213   :  { %573 = vsyncpa [#allocation4 + $0x1], 1 }

</bundles_post_ra>
